<compile_context>
chip_gen: v7x
topology: tpu7x:2x2x1
jax: 0.10.0
libtpu: 0.0.40
codegen_flags: <defaults>
</compile_context>

<pallas_src>
import math

import jax
import jax.numpy as jnp
from jax.experimental import pallas as pl
from jax.experimental.pallas import tpu as pltpu


# Row indices inside the packed bias/LayerNorm vector slab (fp32, (ROWS, WMAX)).
(ROW_BQ, ROW_BKV, ROW_BO, ROW_LN1G, ROW_LN1B, ROW_B1, ROW_B2,
 ROW_LN2G, ROW_LN2B, ROW_CB1, ROW_CB2) = range(11)
NUM_VEC_ROWS = 11


# ----------------------- fused encoder + classifier kernel -----------------------
def fused_kernel(x_ref, xcls_ref, mask_ref,
                 wq_ref, wkv_ref, wo_ref, w1_ref, w2_ref, cw1_ref, cw2_ref,
                 vecs_ref,
                 cls_ref, logits_ref):
    D = wq_ref.shape[0]
    FF = w1_ref.shape[1]
    H = cw1_ref.shape[1]
    NLP = cw2_ref.shape[1]
    TB, L = mask_ref.shape[0], mask_ref.shape[1]

    def vrow(row, width):                       # (1, width) fp32 bias / LN vector
        return vecs_ref[row:row + 1, :width]

    x = x_ref[...]                               # (TB*L, D) bf16, flat slab
    x_cls = xcls_ref[...][:, 0, :]               # (TB, D)    bf16, token-0 rows
    mask = mask_ref[...]                         # (TB, L, 1) fp32

    # ---- fused K|V projection on the flat slab (bf16 MXU, fp32 accumulate) ----
    kv = jnp.dot(x, wkv_ref[...],
                 preferred_element_type=jnp.float32) + vrow(ROW_BKV, 2 * D)
    k3 = kv[:, :D].reshape(TB, L, D)             # (TB, L, D) fp32
    v3 = kv[:, D:2 * D].reshape(TB, L, D)        # (TB, L, D) fp32

    # ---- Q only for the CLS rows; fold 1/sqrt(D) into q ----
    q = jnp.dot(x_cls, wq_ref[...],
                preferred_element_type=jnp.float32) + vrow(ROW_BQ, D)
    q = q * (1.0 / float(D) ** 0.5)              # (TB, D)

    # ---- single-query attention per sequence, key masking, softmax ----
    # Scores kept in (TB, L, 1) orientation: lane-reduce to build them, sublane
    # reductions for the softmax, no lane<->sublane transposes.
    # TODO(synk): at full sequence lengths / all query rows use the flash-style
    # batched einsum with online softmax instead of this VPU/XLU path.
    s = jnp.sum(q[:, None, :] * k3, axis=-1, keepdims=True)   # (TB, L, 1) fp32
    s = s + (mask - 1.0) * 1e9                                 # mask padded keys
    s = s - jnp.max(s, axis=1, keepdims=True)
    p = jnp.exp(s)
    p = p * pl.reciprocal(jnp.sum(p, axis=1, keepdims=True), approx=True)
    attn = jnp.sum(p * v3, axis=1)                             # (TB, D) fp32

    # ---- output projection + residual + LayerNorm 1 (one-pass stats, fp32) ----
    attn_o = jnp.dot(attn.astype(jnp.bfloat16), wo_ref[...],
                     preferred_element_type=jnp.float32) + vrow(ROW_BO, D)
    h = x_cls.astype(jnp.float32) + attn_o
    mu = jnp.mean(h, axis=-1, keepdims=True)
    ms = jnp.mean(h * h, axis=-1, keepdims=True)
    h = (h - mu) * jax.lax.rsqrt(ms - mu * mu + 1e-5) \
        * vrow(ROW_LN1G, D) + vrow(ROW_LN1B, D)

    # ---- feed-forward on the CLS rows only ----
    f = jnp.dot(h.astype(jnp.bfloat16), w1_ref[...],
                preferred_element_type=jnp.float32) + vrow(ROW_B1, FF)
    # TODO(synk): torch nn.GELU default is exact erf; tanh approximation used here.
    f = jax.nn.gelu(f, approximate=True)
    f = jnp.dot(f.astype(jnp.bfloat16), w2_ref[...],
                preferred_element_type=jnp.float32) + vrow(ROW_B2, D)

    # ---- residual + LayerNorm 2 (one-pass stats) ----
    y = h + f
    mu2 = jnp.mean(y, axis=-1, keepdims=True)
    ms2 = jnp.mean(y * y, axis=-1, keepdims=True)
    y = (y - mu2) * jax.lax.rsqrt(ms2 - mu2 * mu2 + 1e-5) \
        * vrow(ROW_LN2G, D) + vrow(ROW_LN2B, D)

    cls_ref[...] = y[:, None, :]                 # (TB, 1, D) fp32 CLS hidden state

    # ---- fused classifier head (Dropout is identity at inference) ----
    ch = jnp.dot(y.astype(jnp.bfloat16), cw1_ref[...],
                 preferred_element_type=jnp.float32) + vrow(ROW_CB1, H)
    logits = jnp.dot(ch.astype(jnp.bfloat16), cw2_ref[...],
                     preferred_element_type=jnp.float32) + vrow(ROW_CB2, NLP)
    logits_ref[...] = logits[:, None, :]         # (TB, 1, NLP) fp32, lane-dense


# ----------------------------- wrapper -----------------------------
def _pick_tb(B, L):
    """Sequences per grid step: >=2 grid steps when B>=2 (v7x megacore), and
    TB*L >= 256 matmul rows per step when the batch allows it (MXU M-fill)."""
    if B < 2:
        return B
    target = -(-256 // L)                        # ceil(256 / L)
    divisors = [d for d in range(1, B // 2 + 1) if B % d == 0]
    for d in divisors:
        if d >= target:
            return d
    return divisors[-1]


def _nbytes(shape, dtype):
    return math.prod(int(s) for s in shape) * jnp.dtype(dtype).itemsize


def fused_forward(x_flat, x_cls, mask, params, *, B, L):
    D = params["wq"].shape[0]
    FF = params["w1"].shape[1]
    H = params["cls_w1"].shape[1]
    NLP = params["cls_w2"].shape[1]

    TB = _pick_tb(B, L)
    grid = (B // TB,)

    def full(shape):
        # TODO(synk): with a layer grid axis (real 24-layer model) mark these
        # constant-weight specs pipeline_mode=pl.Buffered(1) on v7x and K-tile
        # the FFN weights; double-buffering constants only wastes VMEM.
        return pl.BlockSpec(shape, lambda b: tuple(0 for _ in shape))

    block_defs = [
        ((TB * L, D), x_flat.dtype),             # x slab (bf16)
        ((TB, 1, D), x_cls.dtype),               # token-0 rows (bf16)
        ((TB, L, 1), mask.dtype),                # attention mask (fp32)
        ((D, D), params["wq"].dtype),
        ((D, 2 * D), params["wkv"].dtype),
        ((D, D), params["wo"].dtype),
        ((D, FF), params["w1"].dtype),
        ((FF, D), params["w2"].dtype),
        ((D, H), params["cls_w1"].dtype),
        ((H, NLP), params["cls_w2"].dtype),
        (params["vecs"].shape, params["vecs"].dtype),
        ((TB, 1, D), jnp.float32),               # cls out
        ((TB, 1, NLP), jnp.float32),             # logits out
    ]
    buf_bytes = sum(_nbytes(s, d) for s, d in block_defs)
    # 2x double-buffered pipeline stages + ~2x headroom for fp32 intermediates,
    # clamped to the smallest per-core VMEM across generations (v7x: 64 MiB).
    vmem_limit = int(min(max(4 * buf_bytes, 8 << 20), 64 << 20))

    in_specs = [
        pl.BlockSpec((TB * L, D), lambda b: (b, 0)),
        pl.BlockSpec((TB, 1, D), lambda b: (b, 0, 0)),
        pl.BlockSpec((TB, L, 1), lambda b: (b, 0, 0)),
        full((D, D)),                            # Wq
        full((D, 2 * D)),                        # Wk|Wv fused
        full((D, D)),                            # Wo
        full((D, FF)), full((FF, D)),            # FFN
        full((D, H)), full((H, NLP)),            # classifier
        full(tuple(params["vecs"].shape)),       # packed biases / LN vectors
    ]
    out_shape = (jax.ShapeDtypeStruct((B, 1, D), jnp.float32),
                 jax.ShapeDtypeStruct((B, 1, NLP), jnp.float32))
    out_specs = (pl.BlockSpec((TB, 1, D), lambda b: (b, 0, 0)),
                 pl.BlockSpec((TB, 1, NLP), lambda b: (b, 0, 0)))

    return pl.pallas_call(
        fused_kernel,
        out_shape=out_shape,
        grid=grid,
        in_specs=in_specs,
        out_specs=out_specs,
        compiler_params=pltpu.CompilerParams(
            dimension_semantics=("parallel",),   # batch axis -> v7x megacore
            vmem_limit_bytes=vmem_limit,
        ),
    )(x_flat, x_cls, mask,
      params["wq"], params["wkv"], params["wo"],
      params["w1"], params["w2"],
      params["cls_w1"], params["cls_w2"],
      params["vecs"])


# ----------------------------- full forward -----------------------------
def model_classifier_forward(input_ids, attention_mask, params, *, num_labels):
    # embedding lookup (glue, plain JAX): word + positional embeddings
    B, L = input_ids.shape
    D = params["word_emb"].shape[1]
    x = (params["word_emb"][input_ids] + params["pos_emb"][None, :L, :])
    x = x.astype(jnp.bfloat16)                   # (B, L, D)
    x_flat = x.reshape(B * L, D)                 # flat slab for K/V projection
    x_cls = x[:, 0:1, :]                         # (B, 1, D) token-0 rows (Q + residual)
    mask = attention_mask.astype(jnp.float32).reshape(B, L, 1)

    cls3, logits3 = fused_forward(x_flat, x_cls, mask, params, B=B, L=L)
    logits = logits3[:, 0, :num_labels]          # drop lane padding
    cls = cls3[:, 0, :]
    return logits, cls


# ----------------------------- deterministic parameter init -----------------------------
def init_params(key, vocab, L, D, FF, hidden_dim, num_labels, nl_pad):
    keys = jax.random.split(key, 12)
    s = 0.02

    def nrm(k, shape):
        return (s * jax.random.normal(k, shape)).astype(jnp.bfloat16)

    # fused K|V weight
    wk = s * jax.random.normal(keys[3], (D, D))
    wv = s * jax.random.normal(keys[4], (D, D))
    wkv = jnp.concatenate([wk, wv], axis=1).astype(jnp.bfloat16)

    # classifier output weight padded to a lane-dense width (zeros beyond num_labels)
    cw2_core = s * jax.random.normal(keys[9], (hidden_dim, num_labels))
    cw2 = jnp.zeros((hidden_dim, nl_pad), jnp.float32)
    cw2 = cw2.at[:, :num_labels].set(cw2_core).astype(jnp.bfloat16)

    # packed bias / LayerNorm vector slab (fp32). All biases zero; gammas one.
    wmax = max(D, 2 * D, FF, hidden_dim, nl_pad)
    vecs = jnp.zeros((NUM_VEC_ROWS, wmax), jnp.float32)
    vecs = vecs.at[ROW_LN1G, :D].set(1.0)
    vecs = vecs.at[ROW_LN2G, :D].set(1.0)

    return {
        # embeddings kept fp32 (gathered outside the kernel)
        "word_emb": (s * jax.random.normal(keys[0], (vocab, D))).astype(jnp.float32),
        "pos_emb": (s * jax.random.normal(keys[1], (L, D))).astype(jnp.float32),
        # encoder weights bf16
        "wq": nrm(keys[2], (D, D)),
        "wkv": wkv,
        "wo": nrm(keys[5], (D, D)),
        "w1": nrm(keys[6], (D, FF)),
        "w2": nrm(keys[7], (FF, D)),
        # classifier head
        "cls_w1": nrm(keys[8], (D, hidden_dim)),
        "cls_w2": cw2,
        # packed biases / LN params
        "vecs": vecs,
    }


if __name__ == "__main__":
    B, L = 2, 8                  # batch, max_length
    VOCAB = 64
    D = 128                      # embedding_dim   (lane-dense)
    FF = 256                     # encoder FFN width (lane-dense)
    HIDDEN = 128                 # classifier hidden_dim (lane-dense)
    NUM_LABELS = 4               # num_labels
    NL_PAD = 128                 # logits padded to 128 lanes inside the kernel

    root = jax.random.PRNGKey(0)
    k_ids, k_params = jax.random.split(root)

    input_ids = jax.random.randint(k_ids, (B, L), 0, VOCAB, dtype=jnp.int32)
    attention_mask = jnp.ones((B, L), jnp.int32).at[1, L - 2:].set(0)

    params = init_params(k_params, VOCAB, L, D, FF, HIDDEN, NUM_LABELS, NL_PAD)

    logits, cls = model_classifier_forward(input_ids, attention_mask, params,
                                           num_labels=NUM_LABELS)
    jax.block_until_ready((logits, cls))

    assert logits.shape == (B, NUM_LABELS)
    assert cls.shape == (B, D)
    assert bool(jnp.all(jnp.isfinite(logits))) and bool(jnp.all(jnp.isfinite(cls)))
    print("KERNEL_OK")
</pallas_src>

<mosaic_0001>
module attributes {stable_mosaic.version = 11 : i64} {
  func.func @fused_kernel(%arg0: i32, %arg1: memref<8x128xbf16, #tpu.memory_space<vmem>>, %arg2: memref<1x1x128xbf16, #tpu.memory_space<vmem>>, %arg3: memref<1x8x1xf32, #tpu.memory_space<vmem>>, %arg4: memref<128x128xbf16, #tpu.memory_space<vmem>>, %arg5: memref<128x256xbf16, #tpu.memory_space<vmem>>, %arg6: memref<128x128xbf16, #tpu.memory_space<vmem>>, %arg7: memref<128x256xbf16, #tpu.memory_space<vmem>>, %arg8: memref<256x128xbf16, #tpu.memory_space<vmem>>, %arg9: memref<128x128xbf16, #tpu.memory_space<vmem>>, %arg10: memref<128x128xbf16, #tpu.memory_space<vmem>>, %arg11: memref<11x256xf32, #tpu.memory_space<vmem>>, %arg12: memref<1x1x128xf32, #tpu.memory_space<vmem>>, %arg13: memref<1x1x128xf32, #tpu.memory_space<vmem>>) attributes {dimension_semantics = [#tpu.dimension_semantics<parallel>], iteration_bounds = array<i64: 2>, scalar_prefetch = 0 : i64, scratch_operands = 0 : i64, tpu.core_type = #tpu.core_type<tc>, window_params = [{transform_indices = @transform_0, window_bounds = array<i64: 8, 128>}, {transform_indices = @transform_1, window_bounds = array<i64: 1, 1, 128>}, {transform_indices = @transform_2, window_bounds = array<i64: 1, 8, 1>}, {pipeline_mode = #tpu.pipeline_mode<synchronous>, transform_indices = @transform_3, window_bounds = array<i64: 128, 128>}, {pipeline_mode = #tpu.pipeline_mode<synchronous>, transform_indices = @transform_4, window_bounds = array<i64: 128, 256>}, {pipeline_mode = #tpu.pipeline_mode<synchronous>, transform_indices = @transform_5, window_bounds = array<i64: 128, 128>}, {pipeline_mode = #tpu.pipeline_mode<synchronous>, transform_indices = @transform_6, window_bounds = array<i64: 128, 256>}, {pipeline_mode = #tpu.pipeline_mode<synchronous>, transform_indices = @transform_7, window_bounds = array<i64: 256, 128>}, {pipeline_mode = #tpu.pipeline_mode<synchronous>, transform_indices = @transform_8, window_bounds = array<i64: 128, 128>}, {pipeline_mode = #tpu.pipeline_mode<synchronous>, transform_indices = @transform_9, window_bounds = array<i64: 128, 128>}, {pipeline_mode = #tpu.pipeline_mode<synchronous>, transform_indices = @transform_10, window_bounds = array<i64: 11, 256>}, {transform_indices = @transform_11, window_bounds = array<i64: 1, 1, 128>}, {transform_indices = @transform_12, window_bounds = array<i64: 1, 1, 128>}]} {
    %c0 = arith.constant 0 : index
    %c0_0 = arith.constant 0 : index
    %0 = vector.load %arg1[%c0, %c0_0] : memref<8x128xbf16, #tpu.memory_space<vmem>>, vector<8x128xbf16>
    %c0_1 = arith.constant 0 : index
    %c0_2 = arith.constant 0 : index
    %c0_3 = arith.constant 0 : index
    %1 = vector.load %arg2[%c0_1, %c0_2, %c0_3] : memref<1x1x128xbf16, #tpu.memory_space<vmem>>, vector<1x1x128xbf16>
    %2 = vector.shape_cast %1 : vector<1x1x128xbf16> to vector<1x128xbf16>
    %c0_4 = arith.constant 0 : index
    %c0_5 = arith.constant 0 : index
    %c0_6 = arith.constant 0 : index
    %3 = vector.load %arg3[%c0_4, %c0_5, %c0_6] : memref<1x8x1xf32, #tpu.memory_space<vmem>>, vector<1x8x1xf32>
    %c0_7 = arith.constant 0 : index
    %c0_8 = arith.constant 0 : index
    %4 = vector.load %arg5[%c0_7, %c0_8] : memref<128x256xbf16, #tpu.memory_space<vmem>>, vector<128x256xbf16>
    %cst = arith.constant dense<0.000000e+00> : vector<8x256xf32>
    %5 = tpu.matmul %0, %4, %cst {dimension_numbers = #tpu.dot_dimension_numbers<[1], [0], [0], [1], [0, 0, 1, 1], [], []>} : vector<8x128xbf16>, vector<128x256xbf16>, vector<8x256xf32> -> vector<8x256xf32>
    %c1 = arith.constant 1 : index
    %c0_9 = arith.constant 0 : index
    %6 = vector.load %arg11[%c1, %c0_9] : memref<11x256xf32, #tpu.memory_space<vmem>>, vector<1x256xf32>
    %7 = vector.broadcast %6 : vector<1x256xf32> to vector<8x256xf32>
    %8 = arith.addf %5, %7 : vector<8x256xf32>
    %9 = vector.extract_strided_slice %8 {offsets = [0, 0], sizes = [8, 128], strides = [1, 1]} : vector<8x256xf32> to vector<8x128xf32>
    %10 = vector.shape_cast %9 : vector<8x128xf32> to vector<1x8x128xf32>
    %11 = vector.extract_strided_slice %8 {offsets = [0, 128], sizes = [8, 128], strides = [1, 1]} : vector<8x256xf32> to vector<8x128xf32>
    %12 = vector.shape_cast %11 : vector<8x128xf32> to vector<1x8x128xf32>
    %c0_10 = arith.constant 0 : index
    %c0_11 = arith.constant 0 : index
    %13 = vector.load %arg4[%c0_10, %c0_11] : memref<128x128xbf16, #tpu.memory_space<vmem>>, vector<128x128xbf16>
    %cst_12 = arith.constant dense<0.000000e+00> : vector<1x128xf32>
    %14 = tpu.matmul %2, %13, %cst_12 {dimension_numbers = #tpu.dot_dimension_numbers<[1], [0], [0], [1], [0, 0, 1, 1], [], []>} : vector<1x128xbf16>, vector<128x128xbf16>, vector<1x128xf32> -> vector<1x128xf32>
    %c0_13 = arith.constant 0 : index
    %c0_14 = arith.constant 0 : index
    %15 = vector.load %arg11[%c0_13, %c0_14] : memref<11x256xf32, #tpu.memory_space<vmem>>, vector<1x128xf32>
    %16 = arith.addf %14, %15 : vector<1x128xf32>
    %cst_15 = arith.constant 0.0883883461 : f32
    %17 = vector.broadcast %cst_15 : f32 to vector<1x128xf32>
    %18 = arith.mulf %16, %17 : vector<1x128xf32>
    %19 = vector.shape_cast %18 : vector<1x128xf32> to vector<1x1x128xf32>
    %20 = vector.broadcast %19 : vector<1x1x128xf32> to vector<1x8x128xf32>
    %21 = arith.mulf %20, %10 : vector<1x8x128xf32>
    %cst_16 = arith.constant dense<0.000000e+00> : vector<1x8xf32>
    %22 = vector.multi_reduction <add>, %21, %cst_16 [2] : vector<1x8x128xf32> to vector<1x8xf32>
    %23 = vector.shape_cast %22 : vector<1x8xf32> to vector<1x8x1xf32>
    %cst_17 = arith.constant 1.000000e+00 : f32
    %24 = vector.broadcast %cst_17 : f32 to vector<1x8x1xf32>
    %25 = arith.subf %3, %24 : vector<1x8x1xf32>
    %cst_18 = arith.constant 1.000000e+09 : f32
    %26 = vector.broadcast %cst_18 : f32 to vector<1x8x1xf32>
    %27 = arith.mulf %25, %26 : vector<1x8x1xf32>
    %28 = arith.addf %23, %27 : vector<1x8x1xf32>
    %cst_19 = arith.constant dense<0xFF800000> : vector<1x1xf32>
    %29 = vector.multi_reduction <maximumf>, %28, %cst_19 [1] : vector<1x8x1xf32> to vector<1x1xf32>
    %30 = vector.shape_cast %29 : vector<1x1xf32> to vector<1x1x1xf32>
    %31 = vector.broadcast %30 : vector<1x1x1xf32> to vector<1x8x1xf32>
    %32 = arith.subf %28, %31 : vector<1x8x1xf32>
    %33 = math.exp %32 : vector<1x8x1xf32>
    %cst_20 = arith.constant dense<0.000000e+00> : vector<1x1xf32>
    %34 = vector.multi_reduction <add>, %33, %cst_20 [1] : vector<1x8x1xf32> to vector<1x1xf32>
    %35 = vector.shape_cast %34 : vector<1x1xf32> to vector<1x1x1xf32>
    %36 = tpu.reciprocal %35 {approx = true} : vector<1x1x1xf32> -> vector<1x1x1xf32>
    %37 = vector.broadcast %36 : vector<1x1x1xf32> to vector<1x8x1xf32>
    %38 = arith.mulf %33, %37 : vector<1x8x1xf32>
    %39 = vector.broadcast %38 : vector<1x8x1xf32> to vector<1x8x128xf32>
    %40 = arith.mulf %39, %12 : vector<1x8x128xf32>
    %cst_21 = arith.constant dense<0.000000e+00> : vector<1x128xf32>
    %41 = vector.multi_reduction <add>, %40, %cst_21 [1] : vector<1x8x128xf32> to vector<1x128xf32>
    %42 = arith.truncf %41 : vector<1x128xf32> to vector<1x128xbf16>
    %c0_22 = arith.constant 0 : index
    %c0_23 = arith.constant 0 : index
    %43 = vector.load %arg6[%c0_22, %c0_23] : memref<128x128xbf16, #tpu.memory_space<vmem>>, vector<128x128xbf16>
    %cst_24 = arith.constant dense<0.000000e+00> : vector<1x128xf32>
    %44 = tpu.matmul %42, %43, %cst_24 {dimension_numbers = #tpu.dot_dimension_numbers<[1], [0], [0], [1], [0, 0, 1, 1], [], []>} : vector<1x128xbf16>, vector<128x128xbf16>, vector<1x128xf32> -> vector<1x128xf32>
    %c2 = arith.constant 2 : index
    %c0_25 = arith.constant 0 : index
    %45 = vector.load %arg11[%c2, %c0_25] : memref<11x256xf32, #tpu.memory_space<vmem>>, vector<1x128xf32>
    %46 = arith.addf %44, %45 : vector<1x128xf32>
    %47 = arith.extf %2 : vector<1x128xbf16> to vector<1x128xf32>
    %48 = arith.addf %47, %46 : vector<1x128xf32>
    %cst_26 = arith.constant dense<0.000000e+00> : vector<1xf32>
    %49 = vector.multi_reduction <add>, %48, %cst_26 [1] : vector<1x128xf32> to vector<1xf32>
    %50 = vector.shape_cast %49 : vector<1xf32> to vector<1x1xf32>
    %cst_27 = arith.constant 1.280000e+02 : f32
    %51 = vector.broadcast %cst_27 : f32 to vector<1x1xf32>
    %52 = arith.divf %50, %51 : vector<1x1xf32>
    %53 = arith.mulf %48, %48 : vector<1x128xf32>
    %cst_28 = arith.constant dense<0.000000e+00> : vector<1xf32>
    %54 = vector.multi_reduction <add>, %53, %cst_28 [1] : vector<1x128xf32> to vector<1xf32>
    %55 = vector.shape_cast %54 : vector<1xf32> to vector<1x1xf32>
    %cst_29 = arith.constant 1.280000e+02 : f32
    %56 = vector.broadcast %cst_29 : f32 to vector<1x1xf32>
    %57 = arith.divf %55, %56 : vector<1x1xf32>
    %58 = vector.broadcast %52 : vector<1x1xf32> to vector<1x128xf32>
    %59 = arith.subf %48, %58 : vector<1x128xf32>
    %60 = arith.mulf %52, %52 : vector<1x1xf32>
    %61 = arith.subf %57, %60 : vector<1x1xf32>
    %cst_30 = arith.constant 9.99999974E-6 : f32
    %62 = vector.broadcast %cst_30 : f32 to vector<1x1xf32>
    %63 = arith.addf %61, %62 : vector<1x1xf32>
    %64 = math.rsqrt %63 : vector<1x1xf32>
    %65 = vector.broadcast %64 : vector<1x1xf32> to vector<1x128xf32>
    %66 = arith.mulf %59, %65 : vector<1x128xf32>
    %c3 = arith.constant 3 : index
    %c0_31 = arith.constant 0 : index
    %67 = vector.load %arg11[%c3, %c0_31] : memref<11x256xf32, #tpu.memory_space<vmem>>, vector<1x128xf32>
    %68 = arith.mulf %66, %67 : vector<1x128xf32>
    %c4 = arith.constant 4 : index
    %c0_32 = arith.constant 0 : index
    %69 = vector.load %arg11[%c4, %c0_32] : memref<11x256xf32, #tpu.memory_space<vmem>>, vector<1x128xf32>
    %70 = arith.addf %68, %69 : vector<1x128xf32>
    %71 = arith.truncf %70 : vector<1x128xf32> to vector<1x128xbf16>
    %c0_33 = arith.constant 0 : index
    %c0_34 = arith.constant 0 : index
    %72 = vector.load %arg7[%c0_33, %c0_34] : memref<128x256xbf16, #tpu.memory_space<vmem>>, vector<128x256xbf16>
    %cst_35 = arith.constant dense<0.000000e+00> : vector<1x256xf32>
    %73 = tpu.matmul %71, %72, %cst_35 {dimension_numbers = #tpu.dot_dimension_numbers<[1], [0], [0], [1], [0, 0, 1, 1], [], []>} : vector<1x128xbf16>, vector<128x256xbf16>, vector<1x256xf32> -> vector<1x256xf32>
    %c5 = arith.constant 5 : index
    %c0_36 = arith.constant 0 : index
    %74 = vector.load %arg11[%c5, %c0_36] : memref<11x256xf32, #tpu.memory_space<vmem>>, vector<1x256xf32>
    %75 = arith.addf %73, %74 : vector<1x256xf32>
    %76 = arith.mulf %75, %75 : vector<1x256xf32>
    %77 = arith.mulf %75, %76 : vector<1x256xf32>
    %cst_37 = arith.constant 4.471500e-02 : f32
    %78 = vector.broadcast %cst_37 : f32 to vector<1x256xf32>
    %79 = arith.mulf %78, %77 : vector<1x256xf32>
    %80 = arith.addf %75, %79 : vector<1x256xf32>
    %cst_38 = arith.constant 0.797884583 : f32
    %81 = vector.broadcast %cst_38 : f32 to vector<1x256xf32>
    %82 = arith.mulf %81, %80 : vector<1x256xf32>
    %83 = math.tanh %82 : vector<1x256xf32>
    %cst_39 = arith.constant 1.000000e+00 : f32
    %84 = vector.broadcast %cst_39 : f32 to vector<1x256xf32>
    %85 = arith.addf %84, %83 : vector<1x256xf32>
    %cst_40 = arith.constant 5.000000e-01 : f32
    %86 = vector.broadcast %cst_40 : f32 to vector<1x256xf32>
    %87 = arith.mulf %86, %85 : vector<1x256xf32>
    %88 = arith.mulf %75, %87 : vector<1x256xf32>
    %89 = arith.truncf %88 : vector<1x256xf32> to vector<1x256xbf16>
    %c0_41 = arith.constant 0 : index
    %c0_42 = arith.constant 0 : index
    %90 = vector.load %arg8[%c0_41, %c0_42] : memref<256x128xbf16, #tpu.memory_space<vmem>>, vector<256x128xbf16>
    %cst_43 = arith.constant dense<0.000000e+00> : vector<1x128xf32>
    %91 = tpu.matmul %89, %90, %cst_43 {dimension_numbers = #tpu.dot_dimension_numbers<[1], [0], [0], [1], [0, 0, 1, 1], [], []>} : vector<1x256xbf16>, vector<256x128xbf16>, vector<1x128xf32> -> vector<1x128xf32>
    %c6 = arith.constant 6 : index
    %c0_44 = arith.constant 0 : index
    %92 = vector.load %arg11[%c6, %c0_44] : memref<11x256xf32, #tpu.memory_space<vmem>>, vector<1x128xf32>
    %93 = arith.addf %91, %92 : vector<1x128xf32>
    %94 = arith.addf %70, %93 : vector<1x128xf32>
    %cst_45 = arith.constant dense<0.000000e+00> : vector<1xf32>
    %95 = vector.multi_reduction <add>, %94, %cst_45 [1] : vector<1x128xf32> to vector<1xf32>
    %96 = vector.shape_cast %95 : vector<1xf32> to vector<1x1xf32>
    %cst_46 = arith.constant 1.280000e+02 : f32
    %97 = vector.broadcast %cst_46 : f32 to vector<1x1xf32>
    %98 = arith.divf %96, %97 : vector<1x1xf32>
    %99 = arith.mulf %94, %94 : vector<1x128xf32>
    %cst_47 = arith.constant dense<0.000000e+00> : vector<1xf32>
    %100 = vector.multi_reduction <add>, %99, %cst_47 [1] : vector<1x128xf32> to vector<1xf32>
    %101 = vector.shape_cast %100 : vector<1xf32> to vector<1x1xf32>
    %cst_48 = arith.constant 1.280000e+02 : f32
    %102 = vector.broadcast %cst_48 : f32 to vector<1x1xf32>
    %103 = arith.divf %101, %102 : vector<1x1xf32>
    %104 = vector.broadcast %98 : vector<1x1xf32> to vector<1x128xf32>
    %105 = arith.subf %94, %104 : vector<1x128xf32>
    %106 = arith.mulf %98, %98 : vector<1x1xf32>
    %107 = arith.subf %103, %106 : vector<1x1xf32>
    %cst_49 = arith.constant 9.99999974E-6 : f32
    %108 = vector.broadcast %cst_49 : f32 to vector<1x1xf32>
    %109 = arith.addf %107, %108 : vector<1x1xf32>
    %110 = math.rsqrt %109 : vector<1x1xf32>
    %111 = vector.broadcast %110 : vector<1x1xf32> to vector<1x128xf32>
    %112 = arith.mulf %105, %111 : vector<1x128xf32>
    %c7 = arith.constant 7 : index
    %c0_50 = arith.constant 0 : index
    %113 = vector.load %arg11[%c7, %c0_50] : memref<11x256xf32, #tpu.memory_space<vmem>>, vector<1x128xf32>
    %114 = arith.mulf %112, %113 : vector<1x128xf32>
    %c8 = arith.constant 8 : index
    %c0_51 = arith.constant 0 : index
    %115 = vector.load %arg11[%c8, %c0_51] : memref<11x256xf32, #tpu.memory_space<vmem>>, vector<1x128xf32>
    %116 = arith.addf %114, %115 : vector<1x128xf32>
    %117 = vector.shape_cast %116 : vector<1x128xf32> to vector<1x1x128xf32>
    %c0_52 = arith.constant 0 : index
    %c0_53 = arith.constant 0 : index
    %c0_54 = arith.constant 0 : index
    %118 = vector.load %arg12[%c0_52, %c0_53, %c0_54] : memref<1x1x128xf32, #tpu.memory_space<vmem>>, vector<1x1x128xf32>
    tpu.vector_store %arg12[%c0_52, %c0_53, %c0_54], %117 {strides = array<i32>} : memref<1x1x128xf32, #tpu.memory_space<vmem>>, vector<1x1x128xf32>,
    %119 = arith.truncf %116 : vector<1x128xf32> to vector<1x128xbf16>
    %c0_55 = arith.constant 0 : index
    %c0_56 = arith.constant 0 : index
    %120 = vector.load %arg9[%c0_55, %c0_56] : memref<128x128xbf16, #tpu.memory_space<vmem>>, vector<128x128xbf16>
    %cst_57 = arith.constant dense<0.000000e+00> : vector<1x128xf32>
    %121 = tpu.matmul %119, %120, %cst_57 {dimension_numbers = #tpu.dot_dimension_numbers<[1], [0], [0], [1], [0, 0, 1, 1], [], []>} : vector<1x128xbf16>, vector<128x128xbf16>, vector<1x128xf32> -> vector<1x128xf32>
    %c9 = arith.constant 9 : index
    %c0_58 = arith.constant 0 : index
    %122 = vector.load %arg11[%c9, %c0_58] : memref<11x256xf32, #tpu.memory_space<vmem>>, vector<1x128xf32>
    %123 = arith.addf %121, %122 : vector<1x128xf32>
    %124 = arith.truncf %123 : vector<1x128xf32> to vector<1x128xbf16>
    %c0_59 = arith.constant 0 : index
    %c0_60 = arith.constant 0 : index
    %125 = vector.load %arg10[%c0_59, %c0_60] : memref<128x128xbf16, #tpu.memory_space<vmem>>, vector<128x128xbf16>
    %cst_61 = arith.constant dense<0.000000e+00> : vector<1x128xf32>
    %126 = tpu.matmul %124, %125, %cst_61 {dimension_numbers = #tpu.dot_dimension_numbers<[1], [0], [0], [1], [0, 0, 1, 1], [], []>} : vector<1x128xbf16>, vector<128x128xbf16>, vector<1x128xf32> -> vector<1x128xf32>
    %c10 = arith.constant 10 : index
    %c0_62 = arith.constant 0 : index
    %127 = vector.load %arg11[%c10, %c0_62] : memref<11x256xf32, #tpu.memory_space<vmem>>, vector<1x128xf32>
    %128 = arith.addf %126, %127 : vector<1x128xf32>
    %129 = vector.shape_cast %128 : vector<1x128xf32> to vector<1x1x128xf32>
    %c0_63 = arith.constant 0 : index
    %c0_64 = arith.constant 0 : index
    %c0_65 = arith.constant 0 : index
    %130 = vector.load %arg13[%c0_63, %c0_64, %c0_65] : memref<1x1x128xf32, #tpu.memory_space<vmem>>, vector<1x1x128xf32>
    tpu.vector_store %arg13[%c0_63, %c0_64, %c0_65], %129 {strides = array<i32>} : memref<1x1x128xf32, #tpu.memory_space<vmem>>, vector<1x1x128xf32>,
    return
  }
  func.func @transform_0(%arg0: i32) -> (i32, i32) {
    %c0_i32 = arith.constant 0 : i32
    %c0_i32_0 = arith.constant 0 : i32
    return %arg0, %c0_i32 : i32, i32
  }
  func.func @transform_1(%arg0: i32) -> (i32, i32, i32) {
    %c0_i32 = arith.constant 0 : i32
    %c0_i32_0 = arith.constant 0 : i32
    %c0_i32_1 = arith.constant 0 : i32
    return %arg0, %c0_i32, %c0_i32_0 : i32, i32, i32
  }
  func.func @transform_2(%arg0: i32) -> (i32, i32, i32) {
    %c0_i32 = arith.constant 0 : i32
    %c0_i32_0 = arith.constant 0 : i32
    %c0_i32_1 = arith.constant 0 : i32
    return %arg0, %c0_i32, %c0_i32_0 : i32, i32, i32
  }
  func.func @transform_3(%arg0: i32) -> (i32, i32) {
    %c0_i32 = arith.constant 0 : i32
    %c0_i32_0 = arith.constant 0 : i32
    %c0_i32_1 = arith.constant 0 : i32
    return %c0_i32, %c0_i32_0 : i32, i32
  }
  func.func @transform_4(%arg0: i32) -> (i32, i32) {
    %c0_i32 = arith.constant 0 : i32
    %c0_i32_0 = arith.constant 0 : i32
    %c0_i32_1 = arith.constant 0 : i32
    return %c0_i32, %c0_i32_0 : i32, i32
  }
  func.func @transform_5(%arg0: i32) -> (i32, i32) {
    %c0_i32 = arith.constant 0 : i32
    %c0_i32_0 = arith.constant 0 : i32
    %c0_i32_1 = arith.constant 0 : i32
    return %c0_i32, %c0_i32_0 : i32, i32
  }
  func.func @transform_6(%arg0: i32) -> (i32, i32) {
    %c0_i32 = arith.constant 0 : i32
    %c0_i32_0 = arith.constant 0 : i32
    %c0_i32_1 = arith.constant 0 : i32
    return %c0_i32, %c0_i32_0 : i32, i32
  }
  func.func @transform_7(%arg0: i32) -> (i32, i32) {
    %c0_i32 = arith.constant 0 : i32
    %c0_i32_0 = arith.constant 0 : i32
    %c0_i32_1 = arith.constant 0 : i32
    return %c0_i32, %c0_i32_0 : i32, i32
  }
  func.func @transform_8(%arg0: i32) -> (i32, i32) {
    %c0_i32 = arith.constant 0 : i32
    %c0_i32_0 = arith.constant 0 : i32
    %c0_i32_1 = arith.constant 0 : i32
    return %c0_i32, %c0_i32_0 : i32, i32
  }
  func.func @transform_9(%arg0: i32) -> (i32, i32) {
    %c0_i32 = arith.constant 0 : i32
    %c0_i32_0 = arith.constant 0 : i32
    %c0_i32_1 = arith.constant 0 : i32
    return %c0_i32, %c0_i32_0 : i32, i32
  }
  func.func @transform_10(%arg0: i32) -> (i32, i32) {
    %c0_i32 = arith.constant 0 : i32
    %c0_i32_0 = arith.constant 0 : i32
    %c0_i32_1 = arith.constant 0 : i32
    return %c0_i32, %c0_i32_0 : i32, i32
  }
  func.func @transform_11(%arg0: i32) -> (i32, i32, i32) {
    %c0_i32 = arith.constant 0 : i32
    %c0_i32_0 = arith.constant 0 : i32
    %c0_i32_1 = arith.constant 0 : i32
    return %arg0, %c0_i32, %c0_i32_0 : i32, i32, i32
  }
  func.func @transform_12(%arg0: i32) -> (i32, i32, i32) {
    %c0_i32 = arith.constant 0 : i32
    %c0_i32_0 = arith.constant 0 : i32
    %c0_i32_1 = arith.constant 0 : i32
    return %arg0, %c0_i32, %c0_i32_0 : i32, i32, i32
  }
}

</mosaic_0001>

<bundles_post_ra>
// kernel: tpu_custom_call.1
= control target key start
LH: loop header
LB: loop body
LE: loop exit
PB: predicated region body
PF: predicated region fallthrough
CT: control target
= control target key end

     0   :  { %s3068_s0 = inlined_call_operand.vmem [shape: bf16[16,128], index: 0, kind: input, shape index: {}]   ;;  %s3069_s1 = inlined_call_operand.vmem [shape: bf16[2,1,128], index: 1, kind: input, shape index: {}]   ;;  %s3070_s2 = inlined_call_operand.vmem [shape: f32[2,8,1], index: 2, kind: input, shape index: {}]   ;;  %s3071_s3 = inlined_call_operand.hbm [shape: bf16[128,128], index: 3, kind: input, shape index: {}]   ;;  %s3072_s4 = inlined_call_operand.hbm [shape: bf16[128,256], index: 4, kind: input, shape index: {}]   ;;  %s3073_s5 = inlined_call_operand.hbm [shape: bf16[128,128], index: 5, kind: input, shape index: {}]   ;;  %s3074_s6 = inlined_call_operand.hbm [shape: bf16[128,256], index: 6, kind: input, shape index: {}]   ;;  %s3075_s7 = inlined_call_operand.hbm [shape: bf16[256,128], index: 7, kind: input, shape index: {}]   ;;  %s3076_s8 = inlined_call_operand.hbm [shape: bf16[128,128], index: 8, kind: input, shape index: {}]   ;;  %s3077_s9 = inlined_call_operand.hbm [shape: bf16[128,128], index: 9, kind: input, shape index: {}]   ;;  %s3078_s10 = inlined_call_operand.vmem [shape: f32[11,256], index: 10, kind: input, shape index: {}]   ;;  %s3079_s11 = inlined_call_operand.hbm [shape: f32[2,1,128], index: 11, kind: output, shape index: {0}]   ;;  %s3080_s12 = inlined_call_operand.hbm [shape: f32[2,1,128], index: 12, kind: output, shape index: {1}]  }
   0x1   :  { %3091 = sst [smem:[#allocation29_spill]] %s3072_s4 }
   0x2   :  { %3092 = sst [smem:[#allocation30_spill]] %s3080_s12 }
   0x3   :  { %18 = vsyncpa [#allocation3], 0 }
   0x4   :  { %19 = vsyncpa [#allocation6], 0 }
   0x5   :  { %20 = vsyncpa [#allocation9], 0 }
   0x6   :  { %21 = vsyncpa [#allocation12], 0 }
   0x7   :  { %22 = vsyncpa [#allocation4], 0 }
   0x8   :  { %24 = vsyncpa [#allocation4 + $0x1], 0 }
   0x9   :  { %25 = vsyncpa [#allocation16], 0 }
   0xa   :  { %27 = vsyncpa [#allocation16 + $0x1], 0  ;;  %s2624_s21 = smov 0   ;;  %s2626_s22 = smov 0  }
   0xb   :  { %s2628_s23 = smov 0   ;;  %s2630_s24 = smov 0  }
   0xc LB: > { %3093 = sst [smem:[#allocation23_spill]] %s2529_s21  ;;  %s2645_s25 = sadd.s32 4294967295, %s2541_s24   ;;  %s2541_s24 = sphi %s2630_s24, %s3120_s24   ;;  %s2537_s23 = sphi %s2628_s23, %s3122_s23   ;;  %s2533_s22 = sphi %s2626_s22, %s3124_s22   ;;  %s2529_s21 = sphi %s2624_s21, %s3123_s21  }
   0xd   : > { %3094 = sst [smem:[#allocation24_spill]] %s2537_s23  ;;  %s1759_s26 = sadd.s32 4294967294, %s2541_s24  }
   0xe   : > { %3095 = sst [smem:[#allocation25_spill]] %s2541_s24  ;;  %s2649_s27 = sadd.s32 1, %s2541_s24  }
   0xf   : > { %3096 = sst [smem:[#allocation26_spill]] %s2649_s27  ;;  %s286_s28 = sadd.s32 1, %s2537_s23 }
  0x10   : > { %s283_s29 = ssub.s32 %s2541_s24, %s2649_s27  ;;  %p296_p0 = scmp.ne.s32.totalorder %s2537_s23, %s2533_s22 }
  0x11   : > { %p284_p1 = scmp.eq.s32.totalorder %s283_s29, 0  ;;  %p297_p2 = scmp.eq.s32.totalorder %s2645_s25, 1 }
  0x12   : > { %p302_p3 = scmp.ne.s32.totalorder %s2533_s22, %s2529_s21  ;;  %p303_p4 = scmp.eq.s32.totalorder %s1759_s26, 1 }
  0x13   : > { %s2660_s30 = scalar_select %p284_p1, %s2537_s23, %s286_s28  }
  0x14   : > { %p2662_p5 = por %p297_p2, %p296_p0  ;;  %p2666_p6 = por %p303_p4, %p302_p3 }
  0x15   : > { %3097 = sst [smem:[#allocation27_spill]] %s2660_s30  ;;  %p1760_p7 = scmp.ge.s32.totalorder %s2541_s24, 1 }
  0x16   : > { %s3098_s13 = scalar_select %p2662_p5, 1, 0 }
  0x17   : > { %s3099_s14 = scalar_select %p2666_p6, 1, 0 }
  0x18   : > { %p336_p8 = scmp.lt.s32.totalorder %s2541_s24, 3  ;;  %p3084_p9 = scmp.eq.s32.totalorder %s2645_s25, 0 }
  0x19   : > { %3100 = sst [smem:[#allocation28_spill]] %s3099_s14  ;;  %s2543_s16 = smov [#allocation5]  }
  0x1a   : > { %p2673_p10 = pnand %p1760_p7, %p336_p8  ;;  %s361_s17 = sshll.u32 %s2543_s16, 4  ;;  %s362_s17 = int_to_ptr.vmem [resolvable:$true] %s361_s17 }
  0x1b   : > { %s2544_s19 = smov [#allocation8]   ;;  %s3103_s4 = sld [smem:[#allocation29_spill]] }
  0x1c   : > { %s3101_s15 = scalar_select %p2673_p10, 1, 0 }
  0x1d   : > { %p2036_p11 = pneg %p2673_p10  ;;  %s387_s20 = sshll.u32 %s2544_s19, 4  ;;  %s2685_s20 = int_to_ptr.vmem [resolvable:$true] %s387_s20 }
  0x1f   : > { %p2681_p12 = pnand %p3084_p9, %p2036_p11 }
  0x21   : > { %s2235_s29 = scalar_lea.hbm %s3103_s4, 2048  ;;  %p2695_p0 = pneg %p2681_p12 }
  0x22   : > { %p2236_p13 = scmp.ne.s32.totalorder %s3103_s4, %s2235_s29  ;;  %p2242_p3 = scmp.lt.u32.totalorder %s2235_s29, %s3103_s4 }
  0x24   : > { %p2238_p1 = pnand %p2695_p0, %p2236_p13 }
  0x26   : > { %p2239_p2 = pneg %p2238_p1 }
  0x28   : > { %p2244_p4 = pnand %p2242_p3, %p2239_p2 }
  0x2a   : > { %2247 = shalt.err (!%p2244_p4)
}
  0x2b   : > { %s2248_s26 = scalar_lea.vmem %s362_s17, 2048  ;;  %p2256_p9 = scmp.lt.s32.totalorder %s362_s17, %s362_s17 }
  0x2c   : > { %p2249_p7 = scmp.ne.s32.totalorder %s362_s17, %s2248_s26  ;;  %p2257_p6 = scmp.lt.s32.totalorder %s2248_s26, %s2248_s26 }
  0x2e   : > { %p2251_p8 = pnand %p2249_p7, %p2695_p0  ;;  %p2258_p5 = por %p2257_p6, %p2256_p9 }
  0x30   : > { %p2252_p11 = pneg %p2251_p8 }
  0x32   : > { %p2259_p10 = pnand %p2258_p5, %p2252_p11 }
  0x34   : > { %2262 = shalt.err (!%p2259_p10)
}
  0x35   : > { %s2545_s23 = smov 128   ;;  %s2546_s30 = smov 8  }
  0x36   : > { %2042 = dma.hbm_to_vmem [thread:$0]  (!%p2681_p12), %s3103_s4, 2048, %s362_s17, [#allocation6], %s2545_s23, %s2545_s23, %s2546_s30  }
  0x37   : > { %s2263_s14 = scalar_lea.hbm %s3074_s6, 2048 }
  0x38   : > { %p2264_p13 = scmp.ne.s32.totalorder %s3074_s6, %s2263_s14  ;;  %p2270_p9 = scmp.lt.u32.totalorder %s2263_s14, %s3074_s6 }
  0x3a   : > { %p2266_p5 = pnand %p2264_p13, %p2695_p0 }
  0x3c   : > { %p2267_p6 = pneg %p2266_p5 }
  0x3e   : > { %p2272_p10 = pnand %p2270_p9, %p2267_p6 }
  0x40   : > { %2275 = shalt.err (!%p2272_p10)
}
  0x41   : > { %s2276_s17 = scalar_lea.vmem %s2685_s20, 2048  ;;  %p2284_p4 = scmp.lt.s32.totalorder %s2685_s20, %s2685_s20 }
  0x42   : > { %p2277_p1 = scmp.ne.s32.totalorder %s2685_s20, %s2276_s17  ;;  %p2285_p7 = scmp.lt.s32.totalorder %s2276_s17, %s2276_s17 }
  0x44   : > { %p2279_p2 = pnand %p2277_p1, %p2695_p0  ;;  %p2286_p8 = por %p2285_p7, %p2284_p4 }
  0x46   : > { %p2280_p3 = pneg %p2279_p2 }
  0x48   : > { %p2287_p11 = pnand %p2286_p8, %p2280_p3 }
  0x4a   : > { %2290 = shalt.err (!%p2287_p11)
}
  0x4b   : > { %2048 = dma.hbm_to_vmem [thread:$0]  (!%p2681_p12), %s3074_s6, 2048, %s2685_s20, [#allocation9], %s2545_s23, %s2545_s23, %s2546_s30  }
  0x4c   : > { %s2547_s24 = smov [#allocation11]   ;;  %s2548_s27 = smov [#allocation2]  }
  0x4d   : > { %s413_s14 = sshll.u32 %s2547_s24, 4  ;;  %s348_s28 = sshll.u32 %s2548_s27, 4  ;;  %s414_s14 = int_to_ptr.vmem [resolvable:$true] %s413_s14  ;;  %s2734_s28 = int_to_ptr.vmem [resolvable:$true] %s348_s28 }
  0x4e   : > { %s2291_s26 = scalar_lea.hbm %s3076_s8, 1024 }
  0x4f   : > { %p2292_p13 = scmp.ne.s32.totalorder %s3076_s8, %s2291_s26  ;;  %p2298_p9 = scmp.lt.u32.totalorder %s2291_s26, %s3076_s8 }
  0x51   : > { %p2294_p5 = pnand %p2292_p13, %p2695_p0 }
  0x53   : > { %p2295_p6 = pneg %p2294_p5 }
  0x55   : > { %p2300_p10 = pnand %p2298_p9, %p2295_p6 }
  0x57   : > { %2303 = shalt.err (!%p2300_p10)
}
  0x58   : > { %s2304_s23 = scalar_lea.vmem %s414_s14, 1024  ;;  %p2312_p4 = scmp.lt.s32.totalorder %s414_s14, %s414_s14 }
  0x59   : > { %p2305_p1 = scmp.ne.s32.totalorder %s414_s14, %s2304_s23  ;;  %p2313_p7 = scmp.lt.s32.totalorder %s2304_s23, %s2304_s23 }
  0x5b   : > { %p2307_p2 = pnand %p2305_p1, %p2695_p0  ;;  %p2314_p8 = por %p2313_p7, %p2312_p4 }
  0x5d   : > { %p2308_p3 = pneg %p2307_p2 }
  0x5f   : > { %p2315_p11 = pnand %p2314_p8, %p2308_p3 }
  0x61   : > { %2318 = shalt.err (!%p2315_p11)
}
  0x62   : > { %s2549_s4 = smov 64   ;;  %s2550_s30 = smov 4  }
  0x63   : > { %2054 = dma.hbm_to_vmem [thread:$0]  (!%p2681_p12), %s3076_s8, 1024, %s414_s14, [#allocation12], %s2549_s4, %s2549_s4, %s2550_s30  }
  0x64   : > { %s2319_s19 = scalar_lea.hbm %s3071_s3, 1024 }
  0x65   : > { %p2320_p13 = scmp.ne.s32.totalorder %s3071_s3, %s2319_s19  ;;  %p2326_p9 = scmp.lt.u32.totalorder %s2319_s19, %s3071_s3 }
  0x67   : > { %p2322_p5 = pnand %p2320_p13, %p2695_p0 }
  0x69   : > { %p2323_p6 = pneg %p2322_p5 }
  0x6b   : > { %p2328_p10 = pnand %p2326_p9, %p2323_p6 }
  0x6d   : > { %2331 = shalt.err (!%p2328_p10)
}
  0x6e   : > { %s2332_s14 = scalar_lea.vmem %s2734_s28, 1024  ;;  %p2340_p4 = scmp.lt.s32.totalorder %s2734_s28, %s2734_s28 }
  0x6f   : > { %p2333_p1 = scmp.ne.s32.totalorder %s2734_s28, %s2332_s14  ;;  %p2341_p7 = scmp.lt.s32.totalorder %s2332_s14, %s2332_s14 }
  0x71   : > { %p2335_p2 = pnand %p2333_p1, %p2695_p0  ;;  %p2342_p8 = por %p2341_p7, %p2340_p4 }
  0x73   : > { %p2336_p3 = pneg %p2335_p2 }
  0x75   : > { %p2343_p11 = pnand %p2342_p8, %p2336_p3 }
  0x77   : > { %2346 = shalt.err (!%p2343_p11)
}
  0x78   : > { %2039 = dma.hbm_to_vmem [thread:$0]  (!%p2681_p12), %s3071_s3, 1024, %s2734_s28, [#allocation3], %s2549_s4, %s2549_s4, %s2550_s30  }
  0x79   : > { %s2551_s24 = smov [#allocation7]   ;;  %s2552_s29 = smov [#allocation10]  }
  0x7a   : > { %s374_s27 = sshll.u32 %s2551_s24, 4  ;;  %s400_s19 = sshll.u32 %s2552_s29, 4  ;;  %s375_s27 = int_to_ptr.vmem [resolvable:$true] %s374_s27  ;;  %s2783_s19 = int_to_ptr.vmem [resolvable:$true] %s400_s19 }
  0x7b   : > { %s2347_s12 = scalar_lea.hbm %s3073_s5, 1024 }
  0x7c   : > { %p2348_p13 = scmp.ne.s32.totalorder %s3073_s5, %s2347_s12  ;;  %p2354_p9 = scmp.lt.u32.totalorder %s2347_s12, %s3073_s5 }
  0x7e   : > { %p2350_p5 = pnand %p2348_p13, %p2695_p0 }
  0x80   : > { %p2351_p6 = pneg %p2350_p5 }
  0x82   : > { %p2356_p10 = pnand %p2354_p9, %p2351_p6 }
  0x84   : > { %2359 = shalt.err (!%p2356_p10)
}
  0x85   : > { %s2360_s21 = scalar_lea.vmem %s375_s27, 1024  ;;  %p2368_p4 = scmp.lt.s32.totalorder %s375_s27, %s375_s27 }
  0x86   : > { %p2361_p1 = scmp.ne.s32.totalorder %s375_s27, %s2360_s21  ;;  %p2369_p7 = scmp.lt.s32.totalorder %s2360_s21, %s2360_s21 }
  0x88   : > { %p2363_p2 = pnand %p2361_p1, %p2695_p0  ;;  %p2370_p8 = por %p2369_p7, %p2368_p4 }
  0x8a   : > { %p2364_p3 = pneg %p2363_p2 }
  0x8c   : > { %p2371_p11 = pnand %p2370_p8, %p2364_p3 }
  0x8e   : > { %2374 = shalt.err (!%p2371_p11)
}
  0x8f   : > { %2045 = dma.hbm_to_vmem [thread:$0]  (!%p2681_p12), %s3073_s5, 1024, %s375_s27, [#allocation6], %s2549_s4, %s2549_s4, %s2550_s30  }
  0x90   : > { %s2375_s12 = scalar_lea.hbm %s3075_s7, 2048 }
  0x91   : > { %p2376_p13 = scmp.ne.s32.totalorder %s3075_s7, %s2375_s12  ;;  %p2382_p9 = scmp.lt.u32.totalorder %s2375_s12, %s3075_s7 }
  0x93   : > { %p2378_p5 = pnand %p2376_p13, %p2695_p0 }
  0x95   : > { %p2379_p6 = pneg %p2378_p5 }
  0x97   : > { %p2384_p10 = pnand %p2382_p9, %p2379_p6 }
  0x99   : > { %2387 = shalt.err (!%p2384_p10)
}
  0x9a   : > { %s2388_s27 = scalar_lea.vmem %s2783_s19, 2048  ;;  %p2396_p4 = scmp.lt.s32.totalorder %s2783_s19, %s2783_s19 }
  0x9b   : > { %p2389_p1 = scmp.ne.s32.totalorder %s2783_s19, %s2388_s27  ;;  %p2397_p7 = scmp.lt.s32.totalorder %s2388_s27, %s2388_s27 }
  0x9d   : > { %p2391_p2 = pnand %p2389_p1, %p2695_p0  ;;  %p2398_p8 = por %p2397_p7, %p2396_p4 }
  0x9f   : > { %p2392_p3 = pneg %p2391_p2 }
  0xa1   : > { %p2399_p11 = pnand %p2398_p8, %p2392_p3 }
  0xa3   : > { %2402 = shalt.err (!%p2399_p11)
}
  0xa4   : > { %2051 = dma.hbm_to_vmem [thread:$0]  (!%p2681_p12), %s3075_s7, 2048, %s2783_s19, [#allocation9], %s2549_s4, %s2549_s4, %s2550_s30  }
  0xa5   : > { %s2553_s29 = smov [#allocation13]   ;;  %s2403_s20 = scalar_lea.hbm %s3077_s9, 1024 }
  0xa6   : > { %s426_s26 = sshll.u32 %s2553_s29, 4  ;;  %p2404_p13 = scmp.ne.s32.totalorder %s3077_s9, %s2403_s20  ;;  %s427_s26 = int_to_ptr.vmem [resolvable:$true] %s426_s26 }
  0xa7   : > { %p2410_p9 = scmp.lt.u32.totalorder %s2403_s20, %s3077_s9 }
  0xa8   : > { %p2406_p5 = pnand %p2404_p13, %p2695_p0 }
  0xaa   : > { %p2407_p6 = pneg %p2406_p5 }
  0xac   : > { %p2412_p10 = pnand %p2410_p9, %p2407_p6 }
  0xae   : > { %2415 = shalt.err (!%p2412_p10)
}
  0xaf   : > { %s2416_s19 = scalar_lea.vmem %s427_s26, 1024  ;;  %p2424_p4 = scmp.lt.s32.totalorder %s427_s26, %s427_s26 }
  0xb0   : > { %p2417_p1 = scmp.ne.s32.totalorder %s427_s26, %s2416_s19  ;;  %p2425_p7 = scmp.lt.s32.totalorder %s2416_s19, %s2416_s19 }
  0xb2   : > { %p2419_p2 = pnand %p2417_p1, %p2695_p0  ;;  %p2426_p8 = por %p2425_p7, %p2424_p4 }
  0xb4   : > { %p2420_p3 = pneg %p2419_p2 }
  0xb6   : > { %p2427_p11 = pnand %p2426_p8, %p2420_p3 }
  0xb8   : > { %2430 = shalt.err (!%p2427_p11)
}
  0xb9   : > { %2057 = dma.hbm_to_vmem [thread:$0]  (!%p2681_p12), %s3077_s9, 1024, %s427_s26, [#allocation12], %s2549_s4, %s2549_s4, %s2550_s30  }
  0xba   : > { %p3105_p13 = scmp.ne.s32.totalorder %s3101_s15, 0 }
  0xbb   : > { %p3106_p0 = scmp.eq.s32.totalorder (!%p3105_p13), %s2645_s25, 0 }
  0xbc   : > { %465 = sbr.rel (%p3105_p13) target bundleno = 2269 (0x8dd), region = 64 }
  0xc3   : > { %2504 = dma.done.wait (%p3106_p0), [#allocation3], 1024   ;;  %p3107_p5 = pmov %p3106_p0 }
  0xc4   : > { %p3108_p6 = pmov %p3106_p0 }
  0xc5   : > { %2506 = vsyncadd (%p3107_p5), [#allocation3], 4294966272 }
  0xc6   : > { %2508 = dma.done.wait (%p3108_p6), [#allocation6], 3072   ;;  %p3109_p9 = pmov %p3106_p0 }
  0xc7   : > { %p3110_p10 = pmov %p3106_p0 }
  0xc8   : > { %2510 = vsyncadd (%p3109_p9), [#allocation6], 4294964224 }
  0xc9   : > { %2512 = dma.done.wait (%p3110_p10), [#allocation9], 4096   ;;  %p3111_p12 = pmov %p3106_p0 }
  0xca   : > { %p3112_p1 = pmov %p3106_p0 }
  0xcb   : > { %2514 = vsyncadd (%p3111_p12), [#allocation9], 4294963200 }
  0xcc   : > { %2516 = dma.done.wait (%p3112_p1), [#allocation12], 2048   ;;  %p3113_p2 = pmov %p3106_p0 }
  0xcd   : > { %v2554_v0 = vmov 0.0   ;;  %vm2555_vm0 = vmmov 0   ;;  %v2556_v1 = vmov 0   ;;  %v2127_v2 = vld [vmem:[#allocation5 + $0x4] ss:$8 sps:$4 sm:$0xff]   ;;  %v2137_v9 = vld [vmem:[#allocation2 + $0x10] sm:$0xff]   ;;  %v574_v28 = vlaneseq }
  0xce   : > { %2518 = vsyncadd (%p3113_p2), [#allocation12], 4294965248  ;;  %1924 = vmatprep.subr.bf16.mxu1 %v2554_v0  ;;  %1940 = vmatprep.mubr.msk.bf16.mxu1 %vm2555_vm0, %v2554_v0  ;;  %v2129_v3 = vld [vmem:[#allocation2] sm:$0xff]   ;;  %v2131_v5 = vld [vmem:[#allocation5 + $0x14] ss:$8 sps:$4 sm:$0xff]   ;;  %p540_p3 = scmp.lt.s32.totalorder %s2645_s25, 1 }
  0xcf   : > { %696 = vmatprep.mubr.bf16.mxu0 %v2556_v1  ;;  %2126 = vset.pattern.permute.xlu0 %v2556_v1  ;;  %v2130_v4 = vld [vmem:[#allocation5] ss:$8 sps:$4 sm:$0xff]   ;;  %v2134_v7 = vld [vmem:[#allocation5 + $0x10] ss:$8 sps:$4 sm:$0xff]   ;;  %v2135_v8 = vld [vmem:[#allocation5 + $0x24] ss:$8 sps:$4 sm:$0xff]  }
  0xd0   : > { %664 = vmatprep.subr.bf16.mxu0 %v2127_v2  ;;  %1925 = vmatpush3.bf16.msra.mxu1 %v2129_v3  ;;  %v2133_v6 = vld [vmem:[#allocation2 + $0x8] sm:$0xff]   ;;  %v2139_v11 = vld [vmem:[#allocation5 + $0x34] ss:$8 sps:$4 sm:$0xff]   ;;  %v2142_v13 = vld [vmem:[#allocation5 + $0x30] ss:$8 sps:$4 sm:$0xff]   ;;  %s2881_s15 = scalar_select %p540_p3, %s2645_s25, 1 }
  0xd1   : > { %665 = vmatpush1.bf16.msra.mxu0 %v2130_v4  ;;  %1926 = vmatprep.subr.bf16.mxu1 %v2554_v0  ;;  %v2138_v10 = vld [vmem:[#allocation5 + $0x20] ss:$8 sps:$4 sm:$0xff]   ;;  %v2141_v12 = vld [vmem:[#allocation2 + $0x18] sm:$0xff]   ;;  %v2143_v14 = vld [vmem:[#allocation5 + $0x44] ss:$8 sps:$4 sm:$0xff]   ;;  %v2902_v29 = vshrl.u32 %v574_v28, 7 }
  0xd2   : > { %666 = vmatprep.subr.bf16.mxu0 %v2131_v5  ;;  %v2145_v15 = vld [vmem:[#allocation2 + $0x20] sm:$0xff]   ;;  %v2147_v17 = vld [vmem:[#allocation5 + $0x54] ss:$8 sps:$4 sm:$0xff]   ;;  %v2149_v18 = vld [vmem:[#allocation2 + $0x28] sm:$0xff]   ;;  %s1777_s18 = sshll.u32 %s2881_s15, 2  ;;  %s546_s30 = scalar_lea.vmem %s3069_s1, %s2881_s15  ;;  %vm821_vm1 = vcmask 7168  }
  0xd3   : > { %v2146_v16 = vld [vmem:[#allocation5 + $0x40] ss:$8 sps:$4 sm:$0xff]   ;;  %v2150_v19 = vld [vmem:[#allocation5 + $0x50] ss:$8 sps:$4 sm:$0xff]   ;;  %v2151_v20 = vld [vmem:[#allocation5 + $0x64] ss:$8 sps:$4 sm:$0xff]   ;;  %s543_s17 = scalar_lea.vmem %s3068_s0, %s1777_s18 }
  0xd4   : > { %1927 = vmatpush3.bf16.msra.mxu1 %v2133_v6  ;;  %v2153_v21 = vld [vmem:[#allocation2 + $0x30] sm:$0xff]   ;;  %v2154_v22 = vld [vmem:[#allocation5 + $0x60] ss:$8 sps:$4 sm:$0xff]   ;;  %v2157_v24 = vld [vmem:[#allocation2 + $0x38] sm:$0xff]   ;;  %v2905_v30 = vsub.s32 0, %v2902_v29  ;;  %v580_v31 = vsub.s32 1, %v2902_v29 }
  0xd5   : > { %667 = vmatpush1.bf16.msra.mxu0 %v2134_v7  ;;  %1928 = vmatprep.subr.bf16.mxu1 %v2554_v0  ;;  %v2155_v23 = vld [vmem:[#allocation5 + $0x74] ss:$8 sps:$4 sm:$0xff]   ;;  %v2158_v25 = vld [vmem:[#allocation5 + $0x70] ss:$8 sps:$4 sm:$0xff]   ;;  %v2895_v26 = vld [vmem:[%s546_s30] sm:$0x1] }
  0xd6   : > { %668 = vmatprep.subr.bf16.mxu0 %v2135_v8  ;;  %v552_v27 = vld [vmem:[%s543_s17] sm:$0xf]  ;;  %v2160_v51 = vld [vmem:[#allocation7 + $0x8] sm:$0xff]   ;;  %v2161_v52 = vld [vmem:[#allocation7 + $0x10] sm:$0xff]   ;;  %s1778_s28 = sshll.u32 %s2881_s15, 3  ;;  %vm961_vm2 = vcmask 1040384  }
  0xd7   : > { %v1779_v32 = vld [vmem:[%s3078_s10 + $0x1] ss:$8 sm:$0x3]  ;;  %v721_v33 = vld [vmem:[%s3078_s10] ss:$0 sm:$0xff]  ;;  %v2162_v53 = vld [vmem:[#allocation7 + $0x18] sm:$0xff]   ;;  %s550_s21 = scalar_lea.vmem %s3070_s2, %s1778_s28 }
  0xd8   : > { %1929 = vmatpush3.bf16.msra.mxu1 %v2137_v9  ;;  %v577_v34 = vrot.slane %v1779_v32, %v2905_v30  ;;  %v581_v35 = vrot.slane %v1779_v32, %v580_v31  ;;  %v2159_v50 = vld [vmem:[#allocation7] sm:$0xff]   ;;  %s2981_s23 = sand.u32 1, %s2533_s22   ;;  %s1862_s15 = sshll.u32 %s2645_s25, 4 }
  0xd9   : > { %669 = vmatpush1.bf16.msra.mxu0 %v2138_v10  ;;  %1930 = vmatprep.subr.bf16.mxu1 %v2554_v0  ;;  %v554_v54 = vld [vmem:[%s550_s21] sm:$0xff]  ;;  %s533_s19 = scalar_lea.vmem [#allocation14], %s2981_s23  ;;  %s2996_s30 = scalar_lea.hbm %s3079_s11, %s1862_s15 }
  0xda   : > { %670 = vmatprep.subr.bf16.mxu0 %v2139_v11  ;;  %v1804_v55 = vadd.f32 -1.0, %v554_v54  ;;  %v2167_v32 = vld [vmem:[#allocation8] ss:$8 sps:$4 sm:$0xff]   ;;  %v2187_v54 = vld [vmem:[#allocation8 + $0x64] ss:$8 sps:$4 sm:$0xff]   ;;  %s1573_s18 = sshll.u32 %s533_s19, 4  ;;  %s1574_s18 = int_to_ptr.vmem [resolvable:$true] %s1573_s18 }
  0xdb   : > { %s1557_s29 = scalar_lea.sflag [#allocation4], %s2981_s23  ;;  %s2431_s26 = scalar_lea.vmem %s1574_s18, 16 }
  0xdc   : > { %1931 = vmatpush3.bf16.msra.mxu1 %v2141_v12  ;;  %v819_v56 = vmul.f32 1e+09, %v1804_v55  ;;  %v2185_v55 = vld [vmem:[#allocation8 + $0x60] ss:$8 sps:$4 sm:$0xff]   ;;  %p2432_p4 = scmp.ne.s32.totalorder %s1574_s18, %s2431_s26  ;;  %p3114_p7 = scmp.ne.s32.totalorder %s3098_s13, 0 }
  0xdd   : > { %671 = vmatpush1.bf16.msra.mxu0 %v2142_v13  ;;  %1932 = vmatprep.subr.bf16.mxu1 %v2554_v0  ;;  %s2557_s17 = smov [#allocation14]  }
  0xde   : > { %672 = vmatprep.subr.bf16.mxu0 %v2143_v14  ;;  %p2433_p8 = pnand %p2432_p4, %p3114_p7  ;;  %s2435_s12 = sshll.u32 %s2557_s17, 4  ;;  %s2436_s12 = int_to_ptr.vmem [resolvable:$false] %s2435_s12 }
  0xdf   : > { %s2437_s20 = scalar_lea.vmem %s2436_s12, 32  ;;  %p2438_p13 = scmp.lt.s32.totalorder %s1574_s18, %s2436_s12 }
  0xe0   : > { %1933 = vmatpush3.bf16.msra.mxu1 %v2145_v15  ;;  %v2163_v15 = vld [vmem:[#allocation7 + $0x20] sm:$0xff]   ;;  %p2434_p11 = pneg %p2433_p8  ;;  %p2439_p0 = scmp.lt.s32.totalorder %s2437_s20, %s2431_s26 }
  0xe1   : > { %673 = vmatpush1.bf16.msra.mxu0 %v2146_v16  ;;  %1934 = vmatprep.subr.bf16.mxu1 %v2554_v0  ;;  %v2164_v16 = vld [vmem:[#allocation7 + $0x28] sm:$0xff]  }
  0xe2   : > { %674 = vmatprep.subr.bf16.mxu0 %v2147_v17  ;;  %v2165_v17 = vld [vmem:[#allocation7 + $0x30] sm:$0xff]   ;;  %p2440_p5 = por %p2439_p0, %p2438_p13 }
  0xe4   : > { %1935 = vmatpush3.bf16.msra.mxu1 %v2149_v18  ;;  %v2166_v18 = vld [vmem:[#allocation7 + $0x38] sm:$0xff]   ;;  %p2441_p6 = pnand %p2440_p5, %p2434_p11 }
  0xe5   : > { %675 = vmatpush1.bf16.msra.mxu0 %v2150_v19  ;;  %1936 = vmatprep.subr.bf16.mxu1 %v2554_v0 }
  0xe6   : > { %676 = vmatprep.subr.bf16.mxu0 %v2151_v20 }
  0xe8   : > { %1937 = vmatpush3.bf16.msra.mxu1 %v2153_v21 }
  0xe9   : > { %677 = vmatpush1.bf16.msra.mxu0 %v2154_v22  ;;  %1938 = vmatprep.subr.bf16.mxu1 %v2554_v0 }
  0xea   : > { %678 = vmatprep.subr.bf16.mxu0 %v2155_v23 }
  0xec   : > { %1939 = vmatpush3.bf16.msra.mxu1 %v2157_v24 }
  0xed   : > { %679 = vmatpush1.bf16.msra.mxu0 %v2158_v25 }
  0xee   : > { %1944 = vmatprep.subr.bf16.mxu0 %v2554_v0 }
  0xef   : > { %1941 = vmatmul.mubr.bf16.vlgmr.msra.gmra.mrb[0].mxu1 %v2895_v26 }
  0xf0   : > { %697 = vmatmul.mubr.bf16.vlgmr.msra.gmra.mrb[0].mxu0 %v552_v27  ;;  %1124 = vmatprep.mubr.bf16.mxu1 %v2556_v1 }
  0xf1   : > { %1960 = vmatprep.mubr.msk.bf16.mxu0 %vm2555_vm0, %v2554_v0  ;;  %1945 = vmatpush3.bf16.msra.mxu0 %v2159_v50  ;;  %v2179_v50 = vld [vmem:[#allocation8 + $0x40] ss:$8 sps:$4 sm:$0xff]  }
  0xf2   : > { %1946 = vmatprep.subr.bf16.mxu0 %v2554_v0 }
  0xf5   : > { %1947 = vmatpush3.bf16.msra.mxu0 %v2160_v51  ;;  %v2181_v51 = vld [vmem:[#allocation8 + $0x44] ss:$8 sps:$4 sm:$0xff]  }
  0xf6   : > { %1948 = vmatprep.subr.bf16.mxu0 %v2554_v0 }
  0xf9   : > { %1949 = vmatpush3.bf16.msra.mxu0 %v2161_v52  ;;  %v2184_v52 = vld [vmem:[#allocation8 + $0x54] ss:$8 sps:$4 sm:$0xff]  }
  0xfa   : > { %1950 = vmatprep.subr.bf16.mxu0 %v2554_v0 }
  0xfd   : > { %1951 = vmatpush3.bf16.msra.mxu0 %v2162_v53  ;;  %v2182_v53 = vld [vmem:[#allocation8 + $0x50] ss:$8 sps:$4 sm:$0xff]  }
  0xfe   : > { %1952 = vmatprep.subr.bf16.mxu0 %v2554_v0 }
 0x101   : > { %1953 = vmatpush3.bf16.msra.mxu0 %v2163_v15  ;;  %v2196_v15 = vld [vmem:[#allocation10 + $0x10] sm:$0xff]  }
 0x102   : > { %1954 = vmatprep.subr.bf16.mxu0 %v2554_v0 }
 0x105   : > { %1955 = vmatpush3.bf16.msra.mxu0 %v2164_v16  ;;  %v2197_v16 = vld [vmem:[#allocation10 + $0x58] sm:$0xff]  }
 0x106   : > { %1956 = vmatprep.subr.bf16.mxu0 %v2554_v0 }
 0x109   : > { %1957 = vmatpush3.bf16.msra.mxu0 %v2165_v17  ;;  %v2198_v17 = vld [vmem:[#allocation10 + $0x18] sm:$0xff]  }
 0x10a   : > { %1958 = vmatprep.subr.bf16.mxu0 %v2554_v0 }
 0x10d   : > { %1959 = vmatpush3.bf16.msra.mxu0 %v2166_v18  ;;  %v2199_v18 = vld [vmem:[#allocation10 + $0x60] sm:$0xff]  }
 0x1c2   : > { %v804_v36 = vpop.f32.mrb[0].mxu1 }
 0x1c3   : > { %v805_v37 = vadd.f32 %v804_v36, %v721_v33  ;;  %v698_v38 = vpop.f32.mrb[0].mxu0  ;;  %v1942_v39 = vpop.f32.mrb[1].mxu1  ;;  %v2169_v33 = vld [vmem:[#allocation8 + $0x4] ss:$8 sps:$4 sm:$0xff]  }
 0x1c4   : > { %v700_v40 = vpop.f32.mrb[1].mxu0  ;;  %v807_v41 = vpop.f32.mrb[2].mxu1  ;;  %v699_v43 = vadd.f32 %v698_v38, %v577_v34  ;;  %1092 = vmatprep.subr.bf16.mxu1 %v2169_v33  ;;  %v870_v34 = vld [vmem:[%s3078_s10 + $0x2] ss:$0 sm:$0xff] }
 0x1c5   : > { %v810_v42 = vmul.f32 0.088388346, %v805_v37  ;;  %v701_v44 = vadd.f32 %v700_v40, %v581_v35  ;;  %v702_v45 = vpop.f32.mrb[2].mxu0  ;;  %v1943_v46 = vpop.f32.mrb[3].mxu1  ;;  %1093 = vmatpush1.bf16.msra.mxu1 %v2167_v32  ;;  %v959_v35 = vunpack.c.l.bf16 %v2895_v26  ;;  %v2173_v26 = vld [vmem:[#allocation8 + $0x20] ss:$8 sps:$4 sm:$0xff]  }
 0x1c6   : > { %v703_v47 = vpop.f32.mrb[3].mxu0  ;;  %v2172_v45 = vld [vmem:[#allocation8 + $0x14] ss:$8 sps:$4 sm:$0xff]   ;;  %v2170_v46 = vld [vmem:[#allocation8 + $0x10] ss:$8 sps:$4 sm:$0xff]  }
 0x1c7   : > { %v814_v48 = vrot.slane %v810_v42, %v2905_v30  ;;  %1094 = vmatprep.subr.bf16.mxu1 %v2172_v45  ;;  %v2175_v47 = vld [vmem:[#allocation8 + $0x24] ss:$8 sps:$4 sm:$0xff]  }
 0x1c9   : > { %v815_v49 = vmul.f32 %v814_v48, %v699_v43  ;;  %1095 = vmatpush1.bf16.msra.mxu1 %v2170_v46  ;;  %v2178_v48 = vld [vmem:[#allocation8 + $0x34] ss:$8 sps:$4 sm:$0xff]  }
 0x1ca   : > { %1096 = vmatprep.subr.bf16.mxu1 %v2175_v47 }
 0x1cb   : > { %816 = vadd.xlane.f32.xlu0 %v815_v49  ;;  %v2176_v49 = vld [vmem:[#allocation8 + $0x30] ss:$8 sps:$4 sm:$0xff]  }
 0x1cd   : > { %1097 = vmatpush1.bf16.msra.mxu1 %v2173_v26 }
 0x1ce   : > { %1098 = vmatprep.subr.bf16.mxu1 %v2178_v48 }
 0x1d1   : > { %1099 = vmatpush1.bf16.msra.mxu1 %v2176_v49 }
 0x1d2   : > { %1100 = vmatprep.subr.bf16.mxu1 %v2181_v51 }
 0x1d5   : > { %1101 = vmatpush1.bf16.msra.mxu1 %v2179_v50 }
 0x1d6   : > { %1102 = vmatprep.subr.bf16.mxu1 %v2184_v52 }
 0x1d9   : > { %1103 = vmatpush1.bf16.msra.mxu1 %v2182_v53 }
 0x1da   : > { %1104 = vmatprep.subr.bf16.mxu1 %v2187_v54 }
 0x1dd   : > { %1105 = vmatpush1.bf16.msra.mxu1 %v2185_v55  ;;  %v2207_v55 = vld [vmem:[#allocation11] sm:$0xff]  }
 0x258   : > { %v817_v57 = vpop.xlane.xlu0 %816 }
 0x259   : > { %v820_v58 = vadd.f32 %v819_v56, %v817_v57  ;;  %v2190_v56 = vld [vmem:[#allocation8 + $0x74] ss:$8 sps:$4 sm:$0xff]   ;;  %v2188_v57 = vld [vmem:[#allocation8 + $0x70] ss:$8 sps:$4 sm:$0xff]  }
 0x25a   : > { %1106 = vmatprep.subr.bf16.mxu1 %v2190_v56 }
 0x25b   : > { %v822_v59 = vsel %vm821_vm1, %v820_v58, -inf  ;;  %1107 = vmatpush1.bf16.msra.mxu1 %v2188_v57  ;;  %v1185_v57 = vld [vmem:[%s3078_s10 + $0x6] ss:$0 sm:$0xff] }
 0x25c   : > { %v823_v60 = vrot.slane %v822_v59, 4  ;;  %1964 = vmatprep.subr.bf16.mxu1 %v2554_v0 }
 0x25e   : > { %v824_v61 = vmax.f32 %v822_v59, %v823_v60 }
 0x260   : > { %v825_v62 = vrot.slane %v824_v61, 2 }
 0x262   : > { %v826_v63 = vmax.f32 %v824_v61, %v825_v62 }
 0x264   : > { %v827_v1 = vrot.slane %v826_v63, 1 }
 0x266   : > { %v828_v2 = vmax.f32 %v826_v63, %v827_v1 }
 0x268   : > { %v829_v3 = vsub.f32 %v820_v58, %v828_v2 }
 0x26a   : > { %v830_v4 = vmul.f32 1.442695, %v829_v3 }
 0x26c   : > { %2223 = vpow2.f32 %v830_v4  ;;  %v978_v4 = vld [vmem:[%s3078_s10 + $0x3] ss:$0 sm:$0xff] }
 0x276   : > { %v2224_v5 = vpop.eup %2223 }
 0x277   : > { %v832_v6 = vsel %vm821_vm1, %v2224_v5, 0.0 }
 0x278   : > { %v833_v7 = vrot.slane %v832_v6, 4 }
 0x27a   : > { %v834_v8 = vadd.f32 %v833_v7, %v832_v6  ;;  %v980_v6 = vld [vmem:[%s3078_s10 + $0x4] ss:$0 sm:$0xff] }
 0x27c   : > { %v835_v9 = vrot.slane %v834_v8, 2 }
 0x27e   : > { %v836_v10 = vadd.f32 %v835_v9, %v834_v8 }
 0x280   : > { %v837_v11 = vrot.slane %v836_v10, 1 }
 0x282   : > { %v838_v12 = vadd.f32 %v837_v11, %v836_v10  ;;  %v2191_v10 = vld [vmem:[#allocation10 + $0x40] sm:$0xff]  }
 0x283   : > { %v2192_v11 = vld [vmem:[#allocation10] sm:$0xff]   ;;  %1884 = vmatprep.subr.bf16.mxu0 %v2191_v10  ;;  %v2214_v10 = vld [vmem:[#allocation11 + $0x38] sm:$0xff]  }
 0x284   : > { %2225 = vrcp.f32 %v838_v12  ;;  %v2193_v12 = vld [vmem:[#allocation10 + $0x48] sm:$0xff]  }
 0x28e   : > { %v2226_v13 = vpop.eup %2225 }
 0x28f   : > { %v840_v14 = vmul.f32 %v2226_v13, %v2224_v5  ;;  %v2194_v13 = vld [vmem:[#allocation10 + $0x8] sm:$0xff]  }
 0x291   : > { %843 = vperm.xlu0 %2126, %v840_v14   ;;  %v2195_v14 = vld [vmem:[#allocation10 + $0x50] sm:$0xff]  }
 0x310   : > { %v844_v19 = vpop.permute.xlu0 %843 }
 0x311   : > { %v846_v20 = vmul.f32 %v844_v19, %v701_v44  ;;  %v2200_v19 = vld [vmem:[#allocation10 + $0x20] sm:$0xff]  }
 0x313   : > { %v847_v21 = vrot.slane %v846_v20, 4 }
 0x315   : > { %v848_v22 = vadd.f32 %v847_v21, %v846_v20  ;;  %v2201_v20 = vld [vmem:[#allocation10 + $0x68] sm:$0xff]  }
 0x316   : > { %v2202_v21 = vld [vmem:[#allocation10 + $0x28] sm:$0xff]  }
 0x317   : > { %v849_v23 = vrot.slane %v848_v22, 2 }
 0x319   : > { %v850_v24 = vadd.f32 %v849_v23, %v848_v22  ;;  %v2203_v22 = vld [vmem:[#allocation10 + $0x70] sm:$0xff]  }
 0x31a   : > { %v2204_v23 = vld [vmem:[#allocation10 + $0x30] sm:$0xff]  }
 0x31b   : > { %v851_v25 = vrot.slane %v850_v24, 1 }
 0x31d   : > { %v852_v27 = vadd.f32 %v851_v25, %v850_v24  ;;  %v2205_v24 = vld [vmem:[#allocation10 + $0x78] sm:$0xff]  }
 0x31e   : > { %v2206_v25 = vld [vmem:[#allocation10 + $0x38] sm:$0xff]  }
 0x31f   : > { %v853_v28 = vpack.c.bf16 %v852_v27, %v852_v27  ;;  %v1813_v27 = vld [vmem:[%s3078_s10 + $0x5] ss:$8 sm:$0x3] }
 0x320   : > { %v1089_v32 = vrot.slane %v1813_v27, %v580_v31 }
 0x321   : > { %1961 = vmatmul.mubr.bf16.vlgmr.msra.gmra.mrb[4].mxu0 %v853_v28  ;;  %v1085_v28 = vrot.slane %v1813_v27, %v2905_v30 }
 0x322   : > { %1885 = vmatpush3.bf16.msra.mxu0 %v2192_v11  ;;  %v2215_v11 = vld [vmem:[#allocation13] sm:$0xff]  }
 0x323   : > { %1886 = vmatprep.subr.bf16.mxu0 %v2193_v12  ;;  %v2216_v12 = vld [vmem:[#allocation13 + $0x8] sm:$0xff]  }
 0x326   : > { %1887 = vmatpush3.bf16.msra.mxu0 %v2194_v13  ;;  %v2217_v13 = vld [vmem:[#allocation13 + $0x10] sm:$0xff]  }
 0x327   : > { %1888 = vmatprep.subr.bf16.mxu0 %v2195_v14  ;;  %v2218_v14 = vld [vmem:[#allocation13 + $0x18] sm:$0xff]  }
 0x32a   : > { %1889 = vmatpush3.bf16.msra.mxu0 %v2196_v15  ;;  %v2219_v15 = vld [vmem:[#allocation13 + $0x20] sm:$0xff]  }
 0x32b   : > { %1890 = vmatprep.subr.bf16.mxu0 %v2197_v16  ;;  %v2220_v16 = vld [vmem:[#allocation13 + $0x28] sm:$0xff]  }
 0x32e   : > { %1891 = vmatpush3.bf16.msra.mxu0 %v2198_v17  ;;  %v2221_v17 = vld [vmem:[#allocation13 + $0x30] sm:$0xff]  }
 0x32f   : > { %1892 = vmatprep.subr.bf16.mxu0 %v2199_v18 }
 0x332   : > { %1893 = vmatpush3.bf16.msra.mxu0 %v2200_v19 }
 0x333   : > { %1894 = vmatprep.subr.bf16.mxu0 %v2201_v20 }
 0x336   : > { %1895 = vmatpush3.bf16.msra.mxu0 %v2202_v21 }
 0x337   : > { %1896 = vmatprep.subr.bf16.mxu0 %v2203_v22 }
 0x33a   : > { %1897 = vmatpush3.bf16.msra.mxu0 %v2204_v23 }
 0x33b   : > { %1898 = vmatprep.subr.bf16.mxu0 %v2205_v24 }
 0x33e   : > { %1899 = vmatpush3.bf16.msra.mxu0 %v2206_v25 }
 0x33f   : > { %1984 = vmatprep.subr.bf16.mxu0 %v2554_v0 }
 0x3f4   : > { %v953_v36 = vpop.f32.mrb[4].mxu0 }
 0x3f5   : > { %v954_v37 = vadd.f32 %v953_v36, %v870_v34  ;;  %v1962_v38 = vpop.f32.mrb[5].mxu0 }
 0x3f6   : > { %v956_v39 = vpop.f32.mrb[6].mxu0 }
 0x3f7   : > { %v960_v40 = vadd.f32 %v959_v35, %v954_v37  ;;  %v1963_v41 = vpop.f32.mrb[7].mxu0 }
 0x3f9   : > { %v962_v42 = vsel %vm961_vm2, %v960_v40, 0.0  ;;  %v967_v43 = vmul.f32 %v960_v40, %v960_v40 }
 0x3fa   : > { %963 = vadd.xlane.f32.xlu1 %v962_v42 }
 0x3fb   : > { %v968_v44 = vsel %vm961_vm2, %v967_v43, 0.0 }
 0x3fe   : > { %969 = vadd.xlane.f32.xlu1 %v968_v44 }
 0x487   : > { %v964_v58 = vpop.xlane.xlu1 %963 }
 0x488   : > { %v966_v59 = vmul.f32 0.0078125, %v964_v58 }
 0x48a   : > { %v973_v61 = vmul.f32 %v966_v59, %v966_v59  ;;  %v972_v2 = vsub.f32 %v960_v40, %v966_v59 }
 0x48b   : > { %v970_v60 = vpop.xlane.xlu1 %969 }
 0x48c   : > { %v971_v62 = vmul.f32 0.0078125, %v970_v60 }
 0x48e   : > { %v974_v63 = vsub.f32 %v971_v62, %v973_v61 }
 0x490   : > { %v975_v1 = vadd.f32 1e-05, %v974_v63 }
 0x492   : > { %2227 = vrsqrt.f32 %v975_v1 }
 0x49c   : > { %v2228_v3 = vpop.eup %2227 }
 0x49d   : > { %v977_v5 = vmul.f32 %v2228_v3, %v972_v2 }
 0x49f   : > { %v979_v7 = vmul.f32 %v978_v4, %v977_v5  ;;  %v2208_v4 = vld [vmem:[#allocation11 + $0x8] sm:$0xff]   ;;  %v2209_v5 = vld [vmem:[#allocation11 + $0x10] sm:$0xff]  }
 0x4a1   : > { %v2942_v8 = vadd.f32 %v980_v6, %v979_v7  ;;  %v2210_v6 = vld [vmem:[#allocation11 + $0x18] sm:$0xff]   ;;  %v2211_v7 = vld [vmem:[#allocation11 + $0x20] sm:$0xff]  }
 0x4a3   : > { %v982_v9 = vpack.c.bf16 %v2942_v8, %v2942_v8 }
 0x4a5   : > { %1125 = vmatmul.mubr.bf16.vlgmr.msra.gmra.mrb[4].mxu1 %v982_v9  ;;  %v2213_v9 = vld [vmem:[#allocation11 + $0x30] sm:$0xff]  }
 0x4a6   : > { %1980 = vmatprep.mubr.msk.bf16.mxu1 %vm2555_vm0, %v2554_v0  ;;  %1965 = vmatpush3.bf16.msra.mxu1 %v2207_v55 }
 0x4a7   : > { %1966 = vmatprep.subr.bf16.mxu1 %v2554_v0 }
 0x4aa   : > { %1967 = vmatpush3.bf16.msra.mxu1 %v2208_v4 }
 0x4ab   : > { %1968 = vmatprep.subr.bf16.mxu1 %v2554_v0 }
 0x4ae   : > { %1969 = vmatpush3.bf16.msra.mxu1 %v2209_v5 }
 0x4af   : > { %1970 = vmatprep.subr.bf16.mxu1 %v2554_v0 }
 0x4b2   : > { %1971 = vmatpush3.bf16.msra.mxu1 %v2210_v6 }
 0x4b3   : > { %1972 = vmatprep.subr.bf16.mxu1 %v2554_v0 }
 0x4b6   : > { %1973 = vmatpush3.bf16.msra.mxu1 %v2211_v7 }
 0x4b7   : > { %1974 = vmatprep.subr.bf16.mxu1 %v2554_v0 }
 0x578   : > { %v1126_v33 = vpop.f32.mrb[4].mxu1 }
 0x579   : > { %v1127_v34 = vadd.f32 %v1126_v33, %v1085_v28  ;;  %v1128_v35 = vpop.f32.mrb[5].mxu1  ;;  %v1338_v28 = vld [vmem:[%s3078_s10 + $0x7] ss:$0 sm:$0xff] }
 0x57a   : > { %v1129_v36 = vadd.f32 %v1128_v35, %v1089_v32  ;;  %v1130_v37 = vpop.f32.mrb[6].mxu1 }
 0x57b   : > { %v1133_v38 = vmul.f32 %v1127_v34, %v1127_v34  ;;  %v1131_v39 = vpop.f32.mrb[7].mxu1  ;;  %v1360_v37 = vld [vmem:[%s3078_s10 + $0x11] ss:$0 sm:$0xff] }
 0x57c   : > { %v1134_v40 = vmul.f32 %v1129_v36, %v1129_v36 }
 0x57d   : > { %v1135_v41 = vmul.f32 %v1133_v38, %v1127_v34 }
 0x57e   : > { %v1136_v42 = vmul.f32 %v1134_v40, %v1129_v36 }
 0x57f   : > { %v1137_v43 = vmul.f32 0.044715, %v1135_v41 }
 0x580   : > { %v1138_v44 = vmul.f32 0.044715, %v1136_v42 }
 0x581   : > { %v1139_v45 = vadd.f32 %v1137_v43, %v1127_v34 }
 0x582   : > { %v1140_v46 = vadd.f32 %v1138_v44, %v1129_v36 }
 0x583   : > { %v1141_v47 = vmul.f32 0.7978846, %v1139_v45 }
 0x584   : > { %v1142_v26 = vmul.f32 0.7978846, %v1140_v46 }
 0x585   : > { %2229 = vtanh.f32 %v1141_v47 }
 0x586   : > { %2231 = vtanh.f32 %v1142_v26 }
 0x58f   : > { %v2230_v29 = vpop.eup %2229 }
 0x590   : > { %v2232_v30 = vpop.eup %2231  ;;  %v1145_v31 = vadd.f32 1.0, %v2230_v29 }
 0x591   : > { %v1146_v48 = vadd.f32 1.0, %v2232_v30 }
 0x592   : > { %v1147_v49 = vmul.f32 0.5, %v1145_v31 }
 0x593   : > { %v1148_v50 = vmul.f32 0.5, %v1146_v48 }
 0x594   : > { %v1149_v51 = vmul.f32 %v1147_v49, %v1127_v34 }
 0x595   : > { %v1150_v52 = vmul.f32 %v1148_v50, %v1129_v36  ;;  %v2222_v36 = vld [vmem:[#allocation13 + $0x38] sm:$0xff]  }
 0x596   : > { %v1151_v54 = vpack.c.bf16 %v1149_v51, %v1149_v51 }
 0x597   : > { %v1152_v53 = vpack.c.bf16 %v1150_v52, %v1150_v52 }
 0x599   : > { %1314 = vmatprep.mubr.bf16.mxu0 %v1152_v53 }
 0x59a   : > { %1315 = vmatmul.mubr.bf16.vlgmr.msra.gmra.mrb[8].mxu0 %v1151_v54 }
 0x59b   : > { %2000 = vmatprep.mubr.msk.bf16.mxu0 %vm2555_vm0, %v2554_v0  ;;  %1985 = vmatpush3.bf16.msra.mxu0 %v2215_v11 }
 0x59c   : > { %1986 = vmatprep.subr.bf16.mxu0 %v2554_v0 }
 0x59f   : > { %1987 = vmatpush3.bf16.msra.mxu0 %v2216_v12 }
 0x5a0   : > { %1988 = vmatprep.subr.bf16.mxu0 %v2554_v0 }
 0x5a3   : > { %1989 = vmatpush3.bf16.msra.mxu0 %v2217_v13 }
 0x5a4   : > { %1990 = vmatprep.subr.bf16.mxu0 %v2554_v0 }
 0x5a7   : > { %1991 = vmatpush3.bf16.msra.mxu0 %v2218_v14 }
 0x5a8   : > { %1992 = vmatprep.subr.bf16.mxu0 %v2554_v0 }
 0x5ab   : > { %1993 = vmatpush3.bf16.msra.mxu0 %v2219_v15 }
 0x5ac   : > { %1994 = vmatprep.subr.bf16.mxu0 %v2554_v0 }
 0x5af   : > { %1995 = vmatpush3.bf16.msra.mxu0 %v2220_v16 }
 0x5b0   : > { %1996 = vmatprep.subr.bf16.mxu0 %v2554_v0 }
 0x5b3   : > { %1997 = vmatpush3.bf16.msra.mxu0 %v2221_v17 }
 0x5b4   : > { %1998 = vmatprep.subr.bf16.mxu0 %v2554_v0 }
 0x5b7   : > { %1999 = vmatpush3.bf16.msra.mxu0 %v2222_v36 }
 0x66d   : > { %v1900_v56 = vpop.f32.mrb[8].mxu0 }
 0x66e   : > { %v1901_v58 = vpop.f32.mrb[9].mxu0 }
 0x66f   : > { %v1902_v59 = vadd.f32 %v1901_v58, %v1900_v56  ;;  %v1903_v60 = vpop.f32.mrb[10].mxu0 }
 0x670   : > { %v1904_v61 = vpop.f32.mrb[11].mxu0 }
 0x671   : > { %v1317_v62 = vadd.f32 %v1902_v59, %v1185_v57 }
 0x673   : > { %v1322_v63 = vadd.f32 %v1317_v62, %v2942_v8  ;;  %v2212_v8 = vld [vmem:[#allocation11 + $0x28] sm:$0xff]  }
 0x674   : > { %1975 = vmatpush3.bf16.msra.mxu1 %v2212_v8 }
 0x675   : > { %v1323_v1 = vsel %vm961_vm2, %v1322_v63, 0.0  ;;  %v1327_v2 = vmul.f32 %v1322_v63, %v1322_v63  ;;  %1976 = vmatprep.subr.bf16.mxu1 %v2554_v0 }
 0x676   : > { %1324 = vadd.xlane.f32.xlu1 %v1323_v1 }
 0x677   : > { %v1328_v3 = vsel %vm961_vm2, %v1327_v2, 0.0 }
 0x678   : > { %1977 = vmatpush3.bf16.msra.mxu1 %v2213_v9 }
 0x679   : > { %1978 = vmatprep.subr.bf16.mxu1 %v2554_v0  ;;  %v1340_v0 = vld [vmem:[%s3078_s10 + $0x10] ss:$0 sm:$0xff] }
 0x67a   : > { %1329 = vadd.xlane.f32.xlu1 %v1328_v3 }
 0x67c   : > { %1979 = vmatpush3.bf16.msra.mxu1 %v2214_v10 }
 0x703   : > { %v1325_v18 = vpop.xlane.xlu1 %1324 }
 0x704   : > { %v1326_v19 = vmul.f32 0.0078125, %v1325_v18 }
 0x706   : > { %v1333_v21 = vmul.f32 %v1326_v19, %v1326_v19  ;;  %v1332_v25 = vsub.f32 %v1322_v63, %v1326_v19 }
 0x707   : > { %v1330_v20 = vpop.xlane.xlu1 %1329 }
 0x708   : > { %v1331_v22 = vmul.f32 0.0078125, %v1330_v20 }
 0x70a   : > { %v1334_v23 = vsub.f32 %v1331_v22, %v1333_v21 }
 0x70c   : > { %v1335_v24 = vadd.f32 1e-05, %v1334_v23 }
 0x70e   : > { %2233 = vrsqrt.f32 %v1335_v24 }
 0x718   : > { %v2234_v27 = vpop.eup %2233 }
 0x719   : > { %v1337_v32 = vmul.f32 %v2234_v27, %v1332_v25 }
 0x71b   : > { %v1339_v33 = vmul.f32 %v1338_v28, %v1337_v32 }
 0x71d   : > { %v1341_v34 = vadd.f32 %v1340_v0, %v1339_v33 }
 0x71f   : > { %v1343_v35 = vpack.c.bf16 %v1341_v34, %v1341_v34  ;;  %1342 = vst [vmem:[%s533_s19] sm:$0x1] %v1341_v34 }
 0x721   : > { %1981 = vmatmul.mubr.bf16.vlgmr.msra.gmra.mrb[8].mxu1 %v1343_v35 }
 0x7f4   : > { %v1443_v38 = vpop.f32.mrb[8].mxu1 }
 0x7f5   : > { %v1444_v39 = vadd.f32 %v1443_v38, %v1360_v37  ;;  %v1982_v40 = vpop.f32.mrb[9].mxu1 }
 0x7f6   : > { %v1446_v41 = vpop.f32.mrb[10].mxu1 }
 0x7f7   : > { %v1449_v42 = vpack.c.bf16 %v1444_v39, %v1444_v39  ;;  %v1983_v43 = vpop.f32.mrb[11].mxu1 }
 0x7f9   : > { %2001 = vmatmul.mubr.bf16.vlgmr.msra.gmra.mrb[12].mxu0 %v1449_v42 }
 0x7fa   : > { %2444 = shalt.err (!%p2441_p6)
}
 0x7fb   : > { %s2445_s14 = scalar_lea.hbm %s2996_s30, 16  ;;  %s2449_s19 = scalar_lea.hbm %s3079_s11, 32 }
 0x7fc   : > { %p2446_p9 = scmp.ne.s32.totalorder %s2996_s30, %s2445_s14  ;;  %p2450_p1 = scmp.lt.u32.totalorder %s2996_s30, %s3079_s11 }
 0x7fd   : > { %p2451_p2 = scmp.lt.u32.totalorder %s2449_s19, %s2445_s14  ;;  %p2453_p4 = scmp.lt.u32.totalorder %s2445_s14, %s2996_s30 }
 0x7fe   : > { %p2447_p10 = pnand %p2446_p9, %p3114_p7 }
 0x7ff   : > { %p2452_p3 = por %p2451_p2, %p2450_p1 }
 0x800   : > { %p2448_p12 = pneg %p2447_p10 }
 0x801   : > { %p2454_p8 = por %p2453_p4, %p2452_p3 }
 0x803   : > { %p2455_p11 = pnand %p2454_p8, %p2448_p12 }
 0x805   : > { %2458 = shalt.err (!%p2455_p11)
}
 0x806   : > { %2032 = dma.vmem_to_hbm [thread:$0]  (%p3114_p7), %s1574_s18, 16, %s2996_s30, %s1557_s29   ;;  %v1466_v44 = vld [vmem:[%s3078_s10 + $0x12] ss:$0 sm:$0xff] }
 0x807   : > { %s539_s26 = scalar_lea.vmem [#allocation15], %s2981_s23  ;;  %s3115_s14 = sld [smem:[#allocation30_spill]] }
 0x808   : > { %s1586_s17 = sshll.u32 %s539_s26, 4  ;;  %s1561_s18 = scalar_lea.sflag [#allocation16], %s2981_s23  ;;  %s3027_s17 = int_to_ptr.vmem [resolvable:$true] %s1586_s17 }
 0x809   : > { %s2459_s30 = scalar_lea.vmem %s3027_s17, 16  ;;  %s2558_s25 = smov [#allocation15]  }
 0x80a   : > { %p2460_p13 = scmp.ne.s32.totalorder %s3027_s17, %s2459_s30  ;;  %s2463_s29 = sshll.u32 %s2558_s25, 4  ;;  %s2464_s29 = int_to_ptr.vmem [resolvable:$false] %s2463_s29 }
 0x80b   : > { %s2465_s27 = scalar_lea.vmem %s2464_s29, 32  ;;  %p2466_p6 = scmp.lt.s32.totalorder %s3027_s17, %s2464_s29 }
 0x80c   : > { %p2461_p0 = pnand %p2460_p13, %p3114_p7  ;;  %p2467_p9 = scmp.lt.s32.totalorder %s2465_s27, %s2459_s30 }
 0x80d   : > { %s3025_s28 = scalar_lea.hbm %s3115_s14, %s1862_s15 }
 0x80e   : > { %p2462_p5 = pneg %p2461_p0  ;;  %p2468_p10 = por %p2467_p9, %p2466_p6 }
 0x810   : > { %p2469_p12 = pnand %p2468_p10, %p2462_p5 }
 0x8cc   : > { %v1549_v45 = vpop.f32.mrb[12].mxu0 }
 0x8cd   : > { %v1550_v46 = vadd.f32 %v1549_v45, %v1466_v44  ;;  %v2002_v47 = vpop.f32.mrb[13].mxu0 }
 0x8ce   : > { %v1552_v26 = vpop.f32.mrb[14].mxu0 }
 0x8cf   : > { %1555 = vst [vmem:[%s539_s26] sm:$0x1] %v1550_v46  ;;  %v2003_v29 = vpop.f32.mrb[15].mxu0 }
 0x8d0   : > { %2472 = shalt.err (!%p2469_p12)
}
 0x8d1   : > { %s2473_s23 = scalar_lea.hbm %s3025_s28, 16  ;;  %s2477_s21 = scalar_lea.hbm %s3115_s14, 32 }
 0x8d2   : > { %p2474_p1 = scmp.ne.s32.totalorder %s3025_s28, %s2473_s23  ;;  %p2478_p4 = scmp.lt.u32.totalorder %s3025_s28, %s3115_s14 }
 0x8d3   : > { %p2479_p8 = scmp.lt.u32.totalorder %s2477_s21, %s2473_s23  ;;  %p2481_p13 = scmp.lt.u32.totalorder %s2473_s23, %s3025_s28 }
 0x8d4   : > { %p2475_p2 = pnand %p2474_p1, %p3114_p7 }
 0x8d5   : > { %p2480_p11 = por %p2479_p8, %p2478_p4 }
 0x8d6   : > { %p2476_p3 = pneg %p2475_p2 }
 0x8d7   : > { %p2482_p0 = por %p2481_p13, %p2480_p11 }
 0x8d9   : > { %p2483_p5 = pnand %p2482_p0, %p2476_p3 }
 0x8db   : > { %2486 = shalt.err (!%p2483_p5)
}
 0x8dc   : > { %2033 = dma.vmem_to_hbm [thread:$0]  (%p3114_p7), %s3027_s17, 16, %s3025_s28, %s1561_s18  }
 0x8dd PF: > { %s3116_s4 = sld [smem:[#allocation25_spill]]  ;;  %s3117_s26 = sld [smem:[#allocation23_spill]] }
 0x8de   : > { %s3118_s12 = sld [smem:[#allocation28_spill]] }
 0x8e3   : > { %p2079_p6 = scmp.ge.s32.totalorder %s3116_s4, 2  ;;  %s1598_s20 = sand.u32 1, %s3117_s26  }
 0x8e4   : > { %p3119_p9 = scmp.ne.s32.totalorder %s3118_s12, 0  ;;  %s1599_s30 = scalar_lea.sflag [#allocation4], %s1598_s20 }
 0x8e6   : > { %p2059_p10 = pnand %p2079_p6, %p3119_p9 }
 0x8e8   : > { %2520 = dma.done.wait (!%p2059_p10), %s1599_s30, 16  }
 0x8e9   : > { %2522 = vsyncadd (!%p2059_p10), %s1599_s30, 4294967280  ;;  %s1607_s25 = scalar_lea.sflag [#allocation16], %s1598_s20 }
 0x8ea   : > { %2524 = dma.done.wait (!%p2059_p10), %s1607_s25, 16  }
 0x8eb   : > { %2526 = vsyncadd (!%p2059_p10), %s1607_s25, 4294967280  ;;  %s3120_s24 = sld [smem:[#allocation26_spill]]  ;;  %s3121_s13 = sld [smem:[#allocation24_spill]] }
 0x8ec   : > { %s3122_s23 = sld [smem:[#allocation27_spill]]  ;;  %s3123_s21 = smov %s2533_s22 }
 0x8f1   : > { %p30_p7 = scmp.ge.s32.totalorder %s3120_s24, 4   ;;  %s3124_s22 = smov %s3121_s13 }
 0x8f3   :  { %32 = sbr.rel (!%p30_p7) target bundleno = 12 (0xc), region = 153 }
 0x8fa   :  { %1611 = vsyncpa [#allocation3], 1 }
 0x8fb   :  { %1613 = vsyncpa [#allocation3 + $0x1], 1 }
 0x8fc   :  { %1614 = vsyncpa [#allocation6], 1 }
 0x8fd   :  { %1615 = vsyncpa [#allocation9], 1 }
 0x8fe   :  { %1616 = vsyncpa [#allocation12], 1 }
 0x8ff   :  { %1617 = vsyncpa [#allocation4], 1 }
 0x900   :  { %1619 = vsyncpa [#allocation4 + $0x1], 1 }
 0x901   :  { %1620 = vsyncpa [#allocation16], 1 }
 0x902   :  { %1622 = vsyncpa [#allocation16 + $0x1], 1 }

</bundles_post_ra>
